<compile_context>
chip_gen: v5e
topology: v5e:2x2
jax: 0.10.0
libtpu: 0.0.40
codegen_flags: <defaults>
</compile_context>

<pallas_src>
import functools
import math

import jax
import jax.numpy as jnp
from jax.experimental import pallas as pl
from jax.experimental.pallas import tpu as pltpu


NEG_INF = -1e20


def _round_up(x, m):
    return ((x + m - 1) // m) * m


def _rep_spec(shape):
    """BlockSpec for a grid-invariant operand (weights): full array each step."""
    idx = (0,) * len(shape)
    return pl.BlockSpec(shape, lambda n, _idx=idx: _idx)


# ----------------------------- in-kernel helpers -----------------------------

def _build_bias(keep_row, lq, causal):
    """Additive 0 / -1e20 bias (lq, lk) built in-kernel from a per-key keep row."""
    lk = keep_row.shape[-1]
    keep = jnp.broadcast_to(keep_row > 0.5, (lq, lk))
    if causal:
        row = jax.lax.broadcasted_iota(jnp.int32, (lq, lk), 0)
        col = jax.lax.broadcasted_iota(jnp.int32, (lq, lk), 1)
        keep = jnp.logical_and(keep, col <= row)
    return jnp.where(keep, 0.0, NEG_INF).astype(jnp.float32)


def _mha(xq, xkv, bias, wq, wk, wv, wo, bo, H):
    """Head-batched multi-head attention + output projection (no residual/LN).

    xq: (Lq, E) f32 queries-side input, xkv: (Lk, E) f32 keys/values-side input,
    bias: (Lq, Lk) f32 additive mask.  Weights: wq/wk/wv (H, E, Dh) bf16 (zero
    outside each head's input slice -> per-head Dh->Dh Linear of the reference),
    wo (H, Dh, E) bf16 (fc_out rows, head-major), bo (1, E) f32.  The softmax
    scale 1/sqrt(E) is pre-folded into wq.
    """
    Lq, E = xq.shape
    Lk = xkv.shape[0]
    xqb = jnp.broadcast_to(xq.astype(jnp.bfloat16), (H, Lq, E))
    xkb = xqb if xkv is xq else jnp.broadcast_to(xkv.astype(jnp.bfloat16),
                                                 (H, Lk, E))
    q = jnp.einsum('hle,hed->hld', xqb, wq,
                   preferred_element_type=jnp.float32).astype(jnp.bfloat16)
    k = jnp.einsum('hle,hed->hld', xkb, wk,
                   preferred_element_type=jnp.float32).astype(jnp.bfloat16)
    v = jnp.einsum('hle,hed->hld', xkb, wv,
                   preferred_element_type=jnp.float32).astype(jnp.bfloat16)

    s = jnp.einsum('hqd,hkd->hqk', q, k, preferred_element_type=jnp.float32)
    s = s + bias[None, :, :]
    s = s - jnp.max(s, axis=-1, keepdims=True)
    p = jnp.exp(s)
    p = p * pl.reciprocal(jnp.sum(p, axis=-1, keepdims=True), approx=True)

    ctx = jnp.einsum('hqk,hkd->hqd', p.astype(jnp.bfloat16), v,
                     preferred_element_type=jnp.float32)
    y = jnp.einsum('hqd,hde->hqe', ctx.astype(jnp.bfloat16), wo,
                   preferred_element_type=jnp.float32)
    return jnp.sum(y, axis=0) + bo                       # (Lq, E) f32


def _layernorm(y, g, b, eps):
    mu = jnp.mean(y, axis=-1, keepdims=True)
    var = jnp.mean((y - mu) ** 2, axis=-1, keepdims=True)
    return (y - mu) * jax.lax.rsqrt(var + eps) * g + b


def _ffn(x, w1, b1, w2, b2):
    h = jnp.dot(x.astype(jnp.bfloat16), w1,
                preferred_element_type=jnp.float32) + b1
    h = jnp.maximum(h, 0.0)
    return jnp.dot(h.astype(jnp.bfloat16), w2,
                   preferred_element_type=jnp.float32) + b2


# ------------------------- fused encoder-layer kernel ------------------------

def _encoder_layer_kernel(x_ref, keep_ref, wq_ref, wk_ref, wv_ref, wo_ref,
                          bo_ref, g1_ref, bn1_ref, w1_ref, b1_ref, w2_ref,
                          b2_ref, g2_ref, bn2_ref, o_ref, *, H, eps):
    x = x_ref[0]                                         # (L, E) f32
    L = x.shape[0]
    bias = _build_bias(keep_ref[0], L, causal=False)
    attn = _mha(x, x, bias, wq_ref[...], wk_ref[...], wv_ref[...],
                wo_ref[...], bo_ref[...], H)
    x1 = _layernorm(attn + x, g1_ref[...], bn1_ref[...], eps)
    y = _ffn(x1, w1_ref[...], b1_ref[...], w2_ref[...], b2_ref[...]) + x1
    o_ref[0] = _layernorm(y, g2_ref[...], bn2_ref[...], eps).astype(o_ref.dtype)


def encoder_layer(x, keep, p, H, eps=1e-5):
    N, L, E = x.shape
    a = p["attn"]
    return pl.pallas_call(
        functools.partial(_encoder_layer_kernel, H=H, eps=eps),
        out_shape=jax.ShapeDtypeStruct((N, L, E), jnp.float32),
        grid=(N,),
        in_specs=[
            pl.BlockSpec((1, L, E), lambda n: (n, 0, 0)),      # x
            pl.BlockSpec((1, 1, L), lambda n: (n, 0, 0)),      # key keep
            _rep_spec(a["Wq"].shape), _rep_spec(a["Wk"].shape),
            _rep_spec(a["Wv"].shape), _rep_spec(a["Wo"].shape),
            _rep_spec(a["bo"].shape),
            _rep_spec(p["ln1_g"].shape), _rep_spec(p["ln1_b"].shape),
            _rep_spec(p["W1"].shape), _rep_spec(p["b1"].shape),
            _rep_spec(p["W2"].shape), _rep_spec(p["b2"].shape),
            _rep_spec(p["ln2_g"].shape), _rep_spec(p["ln2_b"].shape),
        ],
        out_specs=pl.BlockSpec((1, L, E), lambda n: (n, 0, 0)),
        compiler_params=pltpu.CompilerParams(
            dimension_semantics=("parallel",)),
    )(x, keep, a["Wq"], a["Wk"], a["Wv"], a["Wo"], a["bo"],
      p["ln1_g"], p["ln1_b"], p["W1"], p["b1"], p["W2"], p["b2"],
      p["ln2_g"], p["ln2_b"])


# ------------------------- fused decoder-layer kernel ------------------------

def _decoder_layer_kernel(x_ref, enc_ref, tkeep_ref, skeep_ref,
                          swq_ref, swk_ref, swv_ref, swo_ref, sbo_ref,
                          sg_ref, sb_ref,
                          cwq_ref, cwk_ref, cwv_ref, cwo_ref, cbo_ref,
                          g1_ref, bn1_ref,
                          w1_ref, b1_ref, w2_ref, b2_ref,
                          g2_ref, bn2_ref, o_ref, *, H, eps):
    x = x_ref[0]                                         # (Lt, E) f32
    enc = enc_ref[0]                                     # (Ls, E) f32
    Lt = x.shape[0]
    # masked (causal + key-pad) self-attention, residual + LN -> query
    sbias = _build_bias(tkeep_ref[0], Lt, causal=True)
    sa = _mha(x, x, sbias, swq_ref[...], swk_ref[...], swv_ref[...],
              swo_ref[...], sbo_ref[...], H)
    query = _layernorm(sa + x, sg_ref[...], sb_ref[...], eps)
    # cross-attention over encoder keys/values, residual + LN
    cbias = _build_bias(skeep_ref[0], Lt, causal=False)
    ca = _mha(query, enc, cbias, cwq_ref[...], cwk_ref[...], cwv_ref[...],
              cwo_ref[...], cbo_ref[...], H)
    x1 = _layernorm(ca + query, g1_ref[...], bn1_ref[...], eps)
    # feed-forward, residual + LN
    y = _ffn(x1, w1_ref[...], b1_ref[...], w2_ref[...], b2_ref[...]) + x1
    o_ref[0] = _layernorm(y, g2_ref[...], bn2_ref[...], eps).astype(o_ref.dtype)


def decoder_layer(x, enc_out, trg_keep, src_keep, p, H, eps=1e-5):
    N, Lt, E = x.shape
    Ls = enc_out.shape[1]
    sa = p["self_attn"]
    blk = p["block"]
    ca = blk["attn"]
    return pl.pallas_call(
        functools.partial(_decoder_layer_kernel, H=H, eps=eps),
        out_shape=jax.ShapeDtypeStruct((N, Lt, E), jnp.float32),
        grid=(N,),
        in_specs=[
            pl.BlockSpec((1, Lt, E), lambda n: (n, 0, 0)),     # x
            pl.BlockSpec((1, Ls, E), lambda n: (n, 0, 0)),     # enc_out
            pl.BlockSpec((1, 1, Lt), lambda n: (n, 0, 0)),     # trg keep
            pl.BlockSpec((1, 1, Ls), lambda n: (n, 0, 0)),     # src keep
            _rep_spec(sa["Wq"].shape), _rep_spec(sa["Wk"].shape),
            _rep_spec(sa["Wv"].shape), _rep_spec(sa["Wo"].shape),
            _rep_spec(sa["bo"].shape),
            _rep_spec(p["ln_g"].shape), _rep_spec(p["ln_b"].shape),
            _rep_spec(ca["Wq"].shape), _rep_spec(ca["Wk"].shape),
            _rep_spec(ca["Wv"].shape), _rep_spec(ca["Wo"].shape),
            _rep_spec(ca["bo"].shape),
            _rep_spec(blk["ln1_g"].shape), _rep_spec(blk["ln1_b"].shape),
            _rep_spec(blk["W1"].shape), _rep_spec(blk["b1"].shape),
            _rep_spec(blk["W2"].shape), _rep_spec(blk["b2"].shape),
            _rep_spec(blk["ln2_g"].shape), _rep_spec(blk["ln2_b"].shape),
        ],
        out_specs=pl.BlockSpec((1, Lt, E), lambda n: (n, 0, 0)),
        compiler_params=pltpu.CompilerParams(
            dimension_semantics=("parallel",)),
    )(x, enc_out, trg_keep, src_keep,
      sa["Wq"], sa["Wk"], sa["Wv"], sa["Wo"], sa["bo"],
      p["ln_g"], p["ln_b"],
      ca["Wq"], ca["Wk"], ca["Wv"], ca["Wo"], ca["bo"],
      blk["ln1_g"], blk["ln1_b"],
      blk["W1"], blk["b1"], blk["W2"], blk["b2"],
      blk["ln2_g"], blk["ln2_b"])


# ----------------------- lane-dense final vocab projection -------------------

def _vocab_kernel(x_ref, w_ref, b_ref, o_ref):
    o_ref[...] = (jnp.dot(x_ref[...].astype(jnp.bfloat16), w_ref[...],
                          preferred_element_type=jnp.float32)
                  + b_ref[...]).astype(o_ref.dtype)


def vocab_linear(x2d, W, b):
    # TODO(synk): at production vocab/E sizes also tile K with an "arbitrary"
    # accumulator axis and set vmem_limit_bytes (v7x: 64 MiB VMEM).
    M, K = x2d.shape
    Nout = W.shape[1]                       # padded to a multiple of 128
    tile_n = min(Nout, 128)
    tile_m = M
    for t in range(8, M + 1, 8):            # largest divisor of M with >=2 tiles
        if M % t == 0 and M // t >= 2:
            tile_m = t
    grid = (M // tile_m, Nout // tile_n)
    return pl.pallas_call(
        _vocab_kernel,
        out_shape=jax.ShapeDtypeStruct((M, Nout), jnp.float32),
        grid=grid,
        in_specs=[
            pl.BlockSpec((tile_m, K), lambda i, j: (i, 0)),
            pl.BlockSpec((K, tile_n), lambda i, j: (0, j)),
            pl.BlockSpec((1, tile_n), lambda i, j: (0, j)),
        ],
        out_specs=pl.BlockSpec((tile_m, tile_n), lambda i, j: (i, j)),
        compiler_params=pltpu.CompilerParams(
            dimension_semantics=("parallel", "parallel")),
    )(x2d, W, b)


# ------------------------------ parameter init --------------------------------

def _w(key, shape, scale=0.02):
    return scale * jax.random.normal(key, shape, dtype=jnp.float32)


def init_attention_params(key, E, H):
    Dh = E // H
    ks = jax.random.split(key, 4)

    def per_head_embed(k, scale=1.0):
        # (H, E, Dh): head h's weight occupies input rows [h*Dh, (h+1)*Dh),
        # i.e. the per-head Dh->Dh Linear (no bias) of the reference module.
        wh = _w(k, (H, Dh, Dh)) * scale
        W = jnp.zeros((H, E, Dh), jnp.float32)
        for h in range(H):
            W = W.at[h, h * Dh:(h + 1) * Dh, :].set(wh[h])
        return W.astype(jnp.bfloat16)

    Wfc = _w(ks[3], (E, E))                               # fc_out weight (E, E)
    return dict(
        # softmax scale 1/sqrt(E) folded into the query projection at init
        Wq=per_head_embed(ks[0], scale=1.0 / math.sqrt(E)),
        Wk=per_head_embed(ks[1]),
        Wv=per_head_embed(ks[2]),
        Wo=Wfc.reshape(H, Dh, E).astype(jnp.bfloat16),    # head-major rows
        bo=jnp.zeros((1, E), jnp.float32),
    )


def init_encoder_layer_params(key, E, H, FE):
    ks = jax.random.split(key, 3)
    FEE = FE * E
    return dict(
        attn=init_attention_params(ks[0], E, H),
        ln1_g=jnp.ones((1, E), jnp.float32), ln1_b=jnp.zeros((1, E), jnp.float32),
        W1=_w(ks[1], (E, FEE)).astype(jnp.bfloat16),
        b1=jnp.zeros((1, FEE), jnp.float32),
        W2=_w(ks[2], (FEE, E)).astype(jnp.bfloat16),
        b2=jnp.zeros((1, E), jnp.float32),
        ln2_g=jnp.ones((1, E), jnp.float32), ln2_b=jnp.zeros((1, E), jnp.float32),
    )


def init_decoder_layer_params(key, E, H, FE):
    ks = jax.random.split(key, 2)
    return dict(
        self_attn=init_attention_params(ks[0], E, H),
        ln_g=jnp.ones((1, E), jnp.float32), ln_b=jnp.zeros((1, E), jnp.float32),
        block=init_encoder_layer_params(ks[1], E, H, FE),
    )


def init_transformer_params(key, src_vocab, trg_vocab, E, H, FE, layers, max_pos):
    ks = jax.random.split(key, 5 + 2 * layers)
    # Pad the vocab projection to a lane-dense (multiple-of-128) output;
    # logits are sliced back to trg_vocab in decoder_fwd.
    Vp = _round_up(trg_vocab, 128)
    fc_W = jnp.zeros((E, Vp), jnp.float32).at[:, :trg_vocab].set(
        _w(ks[4], (E, trg_vocab)))
    enc = dict(
        word_emb=_w(ks[0], (src_vocab, E)),
        pos_emb=_w(ks[1], (max_pos, E)),
        layers=[init_encoder_layer_params(ks[5 + i], E, H, FE)
                for i in range(layers)],
    )
    dec = dict(
        word_emb=_w(ks[2], (trg_vocab, E)),
        pos_emb=_w(ks[3], (max_pos, E)),
        layers=[init_decoder_layer_params(ks[5 + layers + i], E, H, FE)
                for i in range(layers)],
        fc_W=fc_W.astype(jnp.bfloat16),
        fc_b=jnp.zeros((1, Vp), jnp.float32),
    )
    return dict(encoder=enc, decoder=dec)


# -------------------------------- forward pass --------------------------------

def encoder_fwd(p, src, src_keep, H):
    L = src.shape[1]
    pos = jnp.arange(L)
    # TODO(synk): embedding gather kept in plain-JAX glue (jnp.take), not Pallas.
    x = (jnp.take(p["word_emb"], src, axis=0)
         + jnp.take(p["pos_emb"], pos, axis=0)[None])
    for lp in p["layers"]:
        x = encoder_layer(x, src_keep, lp, H)
    return x


def decoder_fwd(p, trg, enc_out, trg_keep, src_keep, H, trg_vocab):
    N, L = trg.shape
    E = enc_out.shape[-1]
    pos = jnp.arange(L)
    x = (jnp.take(p["word_emb"], trg, axis=0)
         + jnp.take(p["pos_emb"], pos, axis=0)[None])
    for lp in p["layers"]:
        x = decoder_layer(x, enc_out, trg_keep, src_keep, lp, H)
    logits = vocab_linear(x.reshape(-1, E), p["fc_W"], p["fc_b"])
    return logits[:, :trg_vocab].reshape(N, L, trg_vocab)


def transformer_fwd(params, src, trg, src_pad_idx, trg_pad_idx, H, trg_vocab):
    # Compact per-key keep vectors; the 0 / -1e20 biases (incl. the causal
    # triangle) are generated inside the kernels.
    src_keep = (src != src_pad_idx).astype(jnp.float32)[:, None, :]   # (N,1,Ls)
    trg_keep = (trg != trg_pad_idx).astype(jnp.float32)[:, None, :]   # (N,1,Lt)
    enc_out = encoder_fwd(params["encoder"], src, src_keep, H)
    return decoder_fwd(params["decoder"], trg, enc_out, trg_keep, src_keep,
                       H, trg_vocab)


# ------------------------------------ main ------------------------------------

if __name__ == "__main__":
    SRC_VOCAB, TRG_VOCAB = 16, 16
    SRC_PAD, TRG_PAD = 0, 0
    EMBED, HEADS, LAYERS, FE = 32, 4, 2, 4
    MAX_POS = 16
    N, L_SRC, L_TRG = 2, 8, 8

    key = jax.random.PRNGKey(0)
    k_params, k_src, k_trg = jax.random.split(key, 3)

    params = init_transformer_params(
        k_params, SRC_VOCAB, TRG_VOCAB, EMBED, HEADS, FE, LAYERS, MAX_POS)

    src = jax.random.randint(k_src, (N, L_SRC), 0, SRC_VOCAB, dtype=jnp.int32)
    trg = jax.random.randint(k_trg, (N, L_TRG), 0, TRG_VOCAB, dtype=jnp.int32)

    fwd = jax.jit(functools.partial(
        transformer_fwd, src_pad_idx=SRC_PAD, trg_pad_idx=TRG_PAD,
        H=HEADS, trg_vocab=TRG_VOCAB))
    out = fwd(params, src, trg)
    out = jax.block_until_ready(out)
    assert out.shape == (N, L_TRG, TRG_VOCAB), out.shape
    assert bool(jnp.all(jnp.isfinite(out)))
    print("KERNEL_OK")
</pallas_src>

<mosaic_0001>
module attributes {stable_mosaic.version = 11 : i64} {
  func.func @_vocab_kernel(%arg0: i32, %arg1: i32, %arg2: memref<8x32xf32, #tpu.memory_space<vmem>>, %arg3: memref<32x128xbf16, #tpu.memory_space<vmem>>, %arg4: memref<1x128xf32, #tpu.memory_space<vmem>>, %arg5: memref<8x128xf32, #tpu.memory_space<vmem>>) attributes {dimension_semantics = [#tpu.dimension_semantics<parallel>, #tpu.dimension_semantics<parallel>], iteration_bounds = array<i64: 2, 1>, scalar_prefetch = 0 : i64, scratch_operands = 0 : i64, tpu.core_type = #tpu.core_type<tc>, window_params = [{transform_indices = @transform_0, window_bounds = array<i64: 8, 32>}, {transform_indices = @transform_1, window_bounds = array<i64: 32, 128>}, {transform_indices = @transform_2, window_bounds = array<i64: 1, 128>}, {transform_indices = @transform_3, window_bounds = array<i64: 8, 128>}]} {
    %c0 = arith.constant 0 : index
    %c0_0 = arith.constant 0 : index
    %0 = vector.load %arg2[%c0, %c0_0] : memref<8x32xf32, #tpu.memory_space<vmem>>, vector<8x32xf32>
    %1 = arith.truncf %0 : vector<8x32xf32> to vector<8x32xbf16>
    %c0_1 = arith.constant 0 : index
    %c0_2 = arith.constant 0 : index
    %2 = vector.load %arg3[%c0_1, %c0_2] : memref<32x128xbf16, #tpu.memory_space<vmem>>, vector<32x128xbf16>
    %cst = arith.constant dense<0.000000e+00> : vector<8x128xf32>
    %3 = tpu.matmul %1, %2, %cst {dimension_numbers = #tpu.dot_dimension_numbers<[1], [0], [0], [1], [0, 0, 1, 1], [], []>} : vector<8x32xbf16>, vector<32x128xbf16>, vector<8x128xf32> -> vector<8x128xf32>
    %c0_3 = arith.constant 0 : index
    %c0_4 = arith.constant 0 : index
    %4 = vector.load %arg4[%c0_3, %c0_4] : memref<1x128xf32, #tpu.memory_space<vmem>>, vector<1x128xf32>
    %5 = vector.broadcast %4 : vector<1x128xf32> to vector<8x128xf32>
    %6 = arith.addf %3, %5 : vector<8x128xf32>
    %c0_5 = arith.constant 0 : index
    %c0_6 = arith.constant 0 : index
    %7 = vector.load %arg5[%c0_5, %c0_6] : memref<8x128xf32, #tpu.memory_space<vmem>>, vector<8x128xf32>
    tpu.vector_store %arg5[%c0_5, %c0_6], %6 {strides = array<i32>} : memref<8x128xf32, #tpu.memory_space<vmem>>, vector<8x128xf32>,
    return
  }
  func.func @transform_0(%arg0: i32, %arg1: i32) -> (i32, i32) {
    %c0_i32 = arith.constant 0 : i32
    %c0_i32_0 = arith.constant 0 : i32
    return %arg0, %c0_i32 : i32, i32
  }
  func.func @transform_1(%arg0: i32, %arg1: i32) -> (i32, i32) {
    %c0_i32 = arith.constant 0 : i32
    %c0_i32_0 = arith.constant 0 : i32
    return %c0_i32, %arg1 : i32, i32
  }
  func.func @transform_2(%arg0: i32, %arg1: i32) -> (i32, i32) {
    %c0_i32 = arith.constant 0 : i32
    %c0_i32_0 = arith.constant 0 : i32
    return %c0_i32, %arg1 : i32, i32
  }
  func.func @transform_3(%arg0: i32, %arg1: i32) -> (i32, i32) {
    %c0_i32 = arith.constant 0 : i32
    return %arg0, %arg1 : i32, i32
  }
}

module attributes {stable_mosaic.version = 11 : i64} {
  func.func @_encoder_layer_kernel(%arg0: i32, %arg1: memref<1x8x32xf32, #tpu.memory_space<vmem>>, %arg2: memref<1x1x8xf32, #tpu.memory_space<vmem>>, %arg3: memref<4x32x8xbf16, #tpu.memory_space<vmem>>, %arg4: memref<4x32x8xbf16, #tpu.memory_space<vmem>>, %arg5: memref<4x32x8xbf16, #tpu.memory_space<vmem>>, %arg6: memref<4x8x32xbf16, #tpu.memory_space<vmem>>, %arg7: memref<1x32xf32, #tpu.memory_space<vmem>>, %arg8: memref<1x32xf32, #tpu.memory_space<vmem>>, %arg9: memref<1x32xf32, #tpu.memory_space<vmem>>, %arg10: memref<32x128xbf16, #tpu.memory_space<vmem>>, %arg11: memref<1x128xf32, #tpu.memory_space<vmem>>, %arg12: memref<128x32xbf16, #tpu.memory_space<vmem>>, %arg13: memref<1x32xf32, #tpu.memory_space<vmem>>, %arg14: memref<1x32xf32, #tpu.memory_space<vmem>>, %arg15: memref<1x32xf32, #tpu.memory_space<vmem>>, %arg16: memref<1x8x32xf32, #tpu.memory_space<vmem>>) attributes {dimension_semantics = [#tpu.dimension_semantics<parallel>], iteration_bounds = array<i64: 2>, scalar_prefetch = 0 : i64, scratch_operands = 0 : i64, tpu.core_type = #tpu.core_type<tc>, window_params = [{transform_indices = @transform_0, window_bounds = array<i64: 1, 8, 32>}, {transform_indices = @transform_1, window_bounds = array<i64: 1, 1, 8>}, {pipeline_mode = #tpu.pipeline_mode<synchronous>, transform_indices = @transform_2, window_bounds = array<i64: 4, 32, 8>}, {pipeline_mode = #tpu.pipeline_mode<synchronous>, transform_indices = @transform_3, window_bounds = array<i64: 4, 32, 8>}, {pipeline_mode = #tpu.pipeline_mode<synchronous>, transform_indices = @transform_4, window_bounds = array<i64: 4, 32, 8>}, {pipeline_mode = #tpu.pipeline_mode<synchronous>, transform_indices = @transform_5, window_bounds = array<i64: 4, 8, 32>}, {pipeline_mode = #tpu.pipeline_mode<synchronous>, transform_indices = @transform_6, window_bounds = array<i64: 1, 32>}, {pipeline_mode = #tpu.pipeline_mode<synchronous>, transform_indices = @transform_7, window_bounds = array<i64: 1, 32>}, {pipeline_mode = #tpu.pipeline_mode<synchronous>, transform_indices = @transform_8, window_bounds = array<i64: 1, 32>}, {pipeline_mode = #tpu.pipeline_mode<synchronous>, transform_indices = @transform_9, window_bounds = array<i64: 32, 128>}, {pipeline_mode = #tpu.pipeline_mode<synchronous>, transform_indices = @transform_10, window_bounds = array<i64: 1, 128>}, {pipeline_mode = #tpu.pipeline_mode<synchronous>, transform_indices = @transform_11, window_bounds = array<i64: 128, 32>}, {pipeline_mode = #tpu.pipeline_mode<synchronous>, transform_indices = @transform_12, window_bounds = array<i64: 1, 32>}, {pipeline_mode = #tpu.pipeline_mode<synchronous>, transform_indices = @transform_13, window_bounds = array<i64: 1, 32>}, {pipeline_mode = #tpu.pipeline_mode<synchronous>, transform_indices = @transform_14, window_bounds = array<i64: 1, 32>}, {transform_indices = @transform_15, window_bounds = array<i64: 1, 8, 32>}]} {
    %c0 = arith.constant 0 : index
    %c0_0 = arith.constant 0 : index
    %c0_1 = arith.constant 0 : index
    %0 = vector.load %arg1[%c0, %c0_0, %c0_1] : memref<1x8x32xf32, #tpu.memory_space<vmem>>, vector<1x8x32xf32>
    %1 = vector.shape_cast %0 : vector<1x8x32xf32> to vector<8x32xf32>
    %c0_2 = arith.constant 0 : index
    %c0_3 = arith.constant 0 : index
    %c0_4 = arith.constant 0 : index
    %2 = vector.load %arg2[%c0_2, %c0_3, %c0_4] : memref<1x1x8xf32, #tpu.memory_space<vmem>>, vector<1x1x8xf32>
    %3 = vector.shape_cast %2 : vector<1x1x8xf32> to vector<1x8xf32>
    %cst = arith.constant 5.000000e-01 : f32
    %4 = vector.broadcast %cst : f32 to vector<1x8xf32>
    %5 = arith.cmpf ogt, %3, %4 : vector<1x8xf32>
    %6 = vector.shape_cast %5 : vector<1x8xi1> to vector<1x8xi1>
    %7 = vector.broadcast %6 : vector<1x8xi1> to vector<8x8xi1>
    %cst_5 = arith.constant 0.000000e+00 : f32
    %cst_6 = arith.constant -1.000000e+20 : f32
    %8 = vector.broadcast %cst_5 : f32 to vector<8x8xf32>
    %9 = vector.broadcast %cst_6 : f32 to vector<8x8xf32>
    %10 = arith.select %7, %8, %9 : vector<8x8xi1>, vector<8x8xf32>
    %c0_7 = arith.constant 0 : index
    %c0_8 = arith.constant 0 : index
    %c0_9 = arith.constant 0 : index
    %11 = vector.load %arg3[%c0_7, %c0_8, %c0_9] : memref<4x32x8xbf16, #tpu.memory_space<vmem>>, vector<4x32x8xbf16>
    %c0_10 = arith.constant 0 : index
    %c0_11 = arith.constant 0 : index
    %c0_12 = arith.constant 0 : index
    %12 = vector.load %arg4[%c0_10, %c0_11, %c0_12] : memref<4x32x8xbf16, #tpu.memory_space<vmem>>, vector<4x32x8xbf16>
    %c0_13 = arith.constant 0 : index
    %c0_14 = arith.constant 0 : index
    %c0_15 = arith.constant 0 : index
    %13 = vector.load %arg5[%c0_13, %c0_14, %c0_15] : memref<4x32x8xbf16, #tpu.memory_space<vmem>>, vector<4x32x8xbf16>
    %c0_16 = arith.constant 0 : index
    %c0_17 = arith.constant 0 : index
    %c0_18 = arith.constant 0 : index
    %14 = vector.load %arg6[%c0_16, %c0_17, %c0_18] : memref<4x8x32xbf16, #tpu.memory_space<vmem>>, vector<4x8x32xbf16>
    %c0_19 = arith.constant 0 : index
    %c0_20 = arith.constant 0 : index
    %15 = vector.load %arg7[%c0_19, %c0_20] : memref<1x32xf32, #tpu.memory_space<vmem>>, vector<1x32xf32>
    %16 = arith.truncf %1 : vector<8x32xf32> to vector<8x32xbf16>
    %17 = vector.shape_cast %16 : vector<8x32xbf16> to vector<1x8x32xbf16>
    %18 = vector.broadcast %17 : vector<1x8x32xbf16> to vector<4x8x32xbf16>
    "tpu.trace_start"() <{level = 10 : i32, message = "hle,hed->hld"}> : () -> ()
    %cst_21 = arith.constant dense<0.000000e+00> : vector<4x8x8xf32>
    %19 = tpu.matmul %18, %11, %cst_21 {dimension_numbers = #tpu.dot_dimension_numbers<[2], [1], [1], [2], [0, 0, 0, 1, 1, 2], [0], [0]>} : vector<4x8x32xbf16>, vector<4x32x8xbf16>, vector<4x8x8xf32> -> vector<4x8x8xf32>
    "tpu.trace_stop"() : () -> ()
    %20 = arith.truncf %19 : vector<4x8x8xf32> to vector<4x8x8xbf16>
    "tpu.trace_start"() <{level = 10 : i32, message = "hle,hed->hld"}> : () -> ()
    %cst_22 = arith.constant dense<0.000000e+00> : vector<4x8x8xf32>
    %21 = tpu.matmul %18, %12, %cst_22 {dimension_numbers = #tpu.dot_dimension_numbers<[2], [1], [1], [2], [0, 0, 0, 1, 1, 2], [0], [0]>} : vector<4x8x32xbf16>, vector<4x32x8xbf16>, vector<4x8x8xf32> -> vector<4x8x8xf32>
    "tpu.trace_stop"() : () -> ()
    %22 = arith.truncf %21 : vector<4x8x8xf32> to vector<4x8x8xbf16>
    "tpu.trace_start"() <{level = 10 : i32, message = "hle,hed->hld"}> : () -> ()
    %cst_23 = arith.constant dense<0.000000e+00> : vector<4x8x8xf32>
    %23 = tpu.matmul %18, %13, %cst_23 {dimension_numbers = #tpu.dot_dimension_numbers<[2], [1], [1], [2], [0, 0, 0, 1, 1, 2], [0], [0]>} : vector<4x8x32xbf16>, vector<4x32x8xbf16>, vector<4x8x8xf32> -> vector<4x8x8xf32>
    "tpu.trace_stop"() : () -> ()
    %24 = arith.truncf %23 : vector<4x8x8xf32> to vector<4x8x8xbf16>
    "tpu.trace_start"() <{level = 10 : i32, message = "hqd,hkd->hqk"}> : () -> ()
    %cst_24 = arith.constant dense<0.000000e+00> : vector<4x8x8xf32>
    %25 = tpu.matmul %20, %22, %cst_24 {dimension_numbers = #tpu.dot_dimension_numbers<[2], [2], [1], [1], [0, 0, 0, 1, 1, 1], [0], [0]>} : vector<4x8x8xbf16>, vector<4x8x8xbf16>, vector<4x8x8xf32> -> vector<4x8x8xf32>
    "tpu.trace_stop"() : () -> ()
    %26 = vector.shape_cast %10 : vector<8x8xf32> to vector<1x8x8xf32>
    %27 = vector.broadcast %26 : vector<1x8x8xf32> to vector<4x8x8xf32>
    %28 = arith.addf %25, %27 : vector<4x8x8xf32>
    %cst_25 = arith.constant dense<0xFF800000> : vector<4x8xf32>
    %29 = vector.multi_reduction <maximumf>, %28, %cst_25 [2] : vector<4x8x8xf32> to vector<4x8xf32>
    %30 = vector.shape_cast %29 : vector<4x8xf32> to vector<4x8x1xf32>
    %31 = vector.broadcast %30 : vector<4x8x1xf32> to vector<4x8x8xf32>
    %32 = arith.subf %28, %31 : vector<4x8x8xf32>
    %33 = math.exp %32 : vector<4x8x8xf32>
    %cst_26 = arith.constant dense<0.000000e+00> : vector<4x8xf32>
    %34 = vector.multi_reduction <add>, %33, %cst_26 [2] : vector<4x8x8xf32> to vector<4x8xf32>
    %35 = vector.shape_cast %34 : vector<4x8xf32> to vector<4x8x1xf32>
    %36 = tpu.reciprocal %35 {approx = true} : vector<4x8x1xf32> -> vector<4x8x1xf32>
    %37 = vector.broadcast %36 : vector<4x8x1xf32> to vector<4x8x8xf32>
    %38 = arith.mulf %33, %37 : vector<4x8x8xf32>
    %39 = arith.truncf %38 : vector<4x8x8xf32> to vector<4x8x8xbf16>
    "tpu.trace_start"() <{level = 10 : i32, message = "hqk,hkd->hqd"}> : () -> ()
    %cst_27 = arith.constant dense<0.000000e+00> : vector<4x8x8xf32>
    %40 = tpu.matmul %39, %24, %cst_27 {dimension_numbers = #tpu.dot_dimension_numbers<[2], [1], [1], [2], [0, 0, 0, 1, 1, 2], [0], [0]>} : vector<4x8x8xbf16>, vector<4x8x8xbf16>, vector<4x8x8xf32> -> vector<4x8x8xf32>
    "tpu.trace_stop"() : () -> ()
    %41 = arith.truncf %40 : vector<4x8x8xf32> to vector<4x8x8xbf16>
    "tpu.trace_start"() <{level = 10 : i32, message = "hqd,hde->hqe"}> : () -> ()
    %cst_28 = arith.constant dense<0.000000e+00> : vector<4x8x32xf32>
    %42 = tpu.matmul %41, %14, %cst_28 {dimension_numbers = #tpu.dot_dimension_numbers<[2], [1], [1], [2], [0, 0, 0, 1, 1, 2], [0], [0]>} : vector<4x8x8xbf16>, vector<4x8x32xbf16>, vector<4x8x32xf32> -> vector<4x8x32xf32>
    "tpu.trace_stop"() : () -> ()
    %cst_29 = arith.constant dense<0.000000e+00> : vector<8x32xf32>
    %43 = vector.multi_reduction <add>, %42, %cst_29 [0] : vector<4x8x32xf32> to vector<8x32xf32>
    %44 = vector.broadcast %15 : vector<1x32xf32> to vector<8x32xf32>
    %45 = arith.addf %43, %44 : vector<8x32xf32>
    %46 = arith.addf %45, %1 : vector<8x32xf32>
    %c0_30 = arith.constant 0 : index
    %c0_31 = arith.constant 0 : index
    %47 = vector.load %arg8[%c0_30, %c0_31] : memref<1x32xf32, #tpu.memory_space<vmem>>, vector<1x32xf32>
    %c0_32 = arith.constant 0 : index
    %c0_33 = arith.constant 0 : index
    %48 = vector.load %arg9[%c0_32, %c0_33] : memref<1x32xf32, #tpu.memory_space<vmem>>, vector<1x32xf32>
    %cst_34 = arith.constant dense<0.000000e+00> : vector<8xf32>
    %49 = vector.multi_reduction <add>, %46, %cst_34 [1] : vector<8x32xf32> to vector<8xf32>
    %50 = vector.shape_cast %49 : vector<8xf32> to vector<8x1xf32>
    %cst_35 = arith.constant 3.200000e+01 : f32
    %51 = vector.broadcast %cst_35 : f32 to vector<8x1xf32>
    %52 = arith.divf %50, %51 : vector<8x1xf32>
    %53 = vector.broadcast %52 : vector<8x1xf32> to vector<8x32xf32>
    %54 = arith.subf %46, %53 : vector<8x32xf32>
    %55 = arith.mulf %54, %54 : vector<8x32xf32>
    %cst_36 = arith.constant dense<0.000000e+00> : vector<8xf32>
    %56 = vector.multi_reduction <add>, %55, %cst_36 [1] : vector<8x32xf32> to vector<8xf32>
    %57 = vector.shape_cast %56 : vector<8xf32> to vector<8x1xf32>
    %cst_37 = arith.constant 3.200000e+01 : f32
    %58 = vector.broadcast %cst_37 : f32 to vector<8x1xf32>
    %59 = arith.divf %57, %58 : vector<8x1xf32>
    %60 = vector.broadcast %52 : vector<8x1xf32> to vector<8x32xf32>
    %61 = arith.subf %46, %60 : vector<8x32xf32>
    %cst_38 = arith.constant 9.99999974E-6 : f32
    %62 = vector.broadcast %cst_38 : f32 to vector<8x1xf32>
    %63 = arith.addf %59, %62 : vector<8x1xf32>
    %64 = math.rsqrt %63 : vector<8x1xf32>
    %65 = vector.broadcast %64 : vector<8x1xf32> to vector<8x32xf32>
    %66 = arith.mulf %61, %65 : vector<8x32xf32>
    %67 = vector.broadcast %47 : vector<1x32xf32> to vector<8x32xf32>
    %68 = arith.mulf %66, %67 : vector<8x32xf32>
    %69 = vector.broadcast %48 : vector<1x32xf32> to vector<8x32xf32>
    %70 = arith.addf %68, %69 : vector<8x32xf32>
    %c0_39 = arith.constant 0 : index
    %c0_40 = arith.constant 0 : index
    %71 = vector.load %arg10[%c0_39, %c0_40] : memref<32x128xbf16, #tpu.memory_space<vmem>>, vector<32x128xbf16>
    %c0_41 = arith.constant 0 : index
    %c0_42 = arith.constant 0 : index
    %72 = vector.load %arg11[%c0_41, %c0_42] : memref<1x128xf32, #tpu.memory_space<vmem>>, vector<1x128xf32>
    %c0_43 = arith.constant 0 : index
    %c0_44 = arith.constant 0 : index
    %73 = vector.load %arg12[%c0_43, %c0_44] : memref<128x32xbf16, #tpu.memory_space<vmem>>, vector<128x32xbf16>
    %c0_45 = arith.constant 0 : index
    %c0_46 = arith.constant 0 : index
    %74 = vector.load %arg13[%c0_45, %c0_46] : memref<1x32xf32, #tpu.memory_space<vmem>>, vector<1x32xf32>
    %75 = arith.truncf %70 : vector<8x32xf32> to vector<8x32xbf16>
    %cst_47 = arith.constant dense<0.000000e+00> : vector<8x128xf32>
    %76 = tpu.matmul %75, %71, %cst_47 {dimension_numbers = #tpu.dot_dimension_numbers<[1], [0], [0], [1], [0, 0, 1, 1], [], []>} : vector<8x32xbf16>, vector<32x128xbf16>, vector<8x128xf32> -> vector<8x128xf32>
    %77 = vector.broadcast %72 : vector<1x128xf32> to vector<8x128xf32>
    %78 = arith.addf %76, %77 : vector<8x128xf32>
    %cst_48 = arith.constant 0.000000e+00 : f32
    %79 = vector.broadcast %cst_48 : f32 to vector<8x128xf32>
    %80 = arith.maximumf %78, %79 : vector<8x128xf32>
    %81 = arith.truncf %80 : vector<8x128xf32> to vector<8x128xbf16>
    %cst_49 = arith.constant dense<0.000000e+00> : vector<8x32xf32>
    %82 = tpu.matmul %81, %73, %cst_49 {dimension_numbers = #tpu.dot_dimension_numbers<[1], [0], [0], [1], [0, 0, 1, 1], [], []>} : vector<8x128xbf16>, vector<128x32xbf16>, vector<8x32xf32> -> vector<8x32xf32>
    %83 = vector.broadcast %74 : vector<1x32xf32> to vector<8x32xf32>
    %84 = arith.addf %82, %83 : vector<8x32xf32>
    %85 = arith.addf %84, %70 : vector<8x32xf32>
    %c0_50 = arith.constant 0 : index
    %c0_51 = arith.constant 0 : index
    %86 = vector.load %arg14[%c0_50, %c0_51] : memref<1x32xf32, #tpu.memory_space<vmem>>, vector<1x32xf32>
    %c0_52 = arith.constant 0 : index
    %c0_53 = arith.constant 0 : index
    %87 = vector.load %arg15[%c0_52, %c0_53] : memref<1x32xf32, #tpu.memory_space<vmem>>, vector<1x32xf32>
    %cst_54 = arith.constant dense<0.000000e+00> : vector<8xf32>
    %88 = vector.multi_reduction <add>, %85, %cst_54 [1] : vector<8x32xf32> to vector<8xf32>
    %89 = vector.shape_cast %88 : vector<8xf32> to vector<8x1xf32>
    %cst_55 = arith.constant 3.200000e+01 : f32
    %90 = vector.broadcast %cst_55 : f32 to vector<8x1xf32>
    %91 = arith.divf %89, %90 : vector<8x1xf32>
    %92 = vector.broadcast %91 : vector<8x1xf32> to vector<8x32xf32>
    %93 = arith.subf %85, %92 : vector<8x32xf32>
    %94 = arith.mulf %93, %93 : vector<8x32xf32>
    %cst_56 = arith.constant dense<0.000000e+00> : vector<8xf32>
    %95 = vector.multi_reduction <add>, %94, %cst_56 [1] : vector<8x32xf32> to vector<8xf32>
    %96 = vector.shape_cast %95 : vector<8xf32> to vector<8x1xf32>
    %cst_57 = arith.constant 3.200000e+01 : f32
    %97 = vector.broadcast %cst_57 : f32 to vector<8x1xf32>
    %98 = arith.divf %96, %97 : vector<8x1xf32>
    %99 = vector.broadcast %91 : vector<8x1xf32> to vector<8x32xf32>
    %100 = arith.subf %85, %99 : vector<8x32xf32>
    %cst_58 = arith.constant 9.99999974E-6 : f32
    %101 = vector.broadcast %cst_58 : f32 to vector<8x1xf32>
    %102 = arith.addf %98, %101 : vector<8x1xf32>
    %103 = math.rsqrt %102 : vector<8x1xf32>
    %104 = vector.broadcast %103 : vector<8x1xf32> to vector<8x32xf32>
    %105 = arith.mulf %100, %104 : vector<8x32xf32>
    %106 = vector.broadcast %86 : vector<1x32xf32> to vector<8x32xf32>
    %107 = arith.mulf %105, %106 : vector<8x32xf32>
    %108 = vector.broadcast %87 : vector<1x32xf32> to vector<8x32xf32>
    %109 = arith.addf %107, %108 : vector<8x32xf32>
    %c0_59 = arith.constant 0 : index
    %c0_60 = arith.constant 0 : index
    %c0_61 = arith.constant 0 : index
    %110 = vector.load %arg16[%c0_59, %c0_60, %c0_61] : memref<1x8x32xf32, #tpu.memory_space<vmem>>, vector<1x8x32xf32>
    %111 = vector.shape_cast %110 : vector<1x8x32xf32> to vector<8x32xf32>
    %112 = vector.shape_cast %109 : vector<8x32xf32> to vector<1x8x32xf32>
    tpu.vector_store %arg16[%c0_59, %c0_60, %c0_61], %112 {strides = array<i32>} : memref<1x8x32xf32, #tpu.memory_space<vmem>>, vector<1x8x32xf32>,
    return
  }
  func.func @transform_0(%arg0: i32) -> (i32, i32, i32) {
    %c0_i32 = arith.constant 0 : i32
    %c0_i32_0 = arith.constant 0 : i32
    %c0_i32_1 = arith.constant 0 : i32
    return %arg0, %c0_i32, %c0_i32_0 : i32, i32, i32
  }
  func.func @transform_1(%arg0: i32) -> (i32, i32, i32) {
    %c0_i32 = arith.constant 0 : i32
    %c0_i32_0 = arith.constant 0 : i32
    %c0_i32_1 = arith.constant 0 : i32
    return %arg0, %c0_i32, %c0_i32_0 : i32, i32, i32
  }
  func.func @transform_2(%arg0: i32) -> (i32, i32, i32) {
    %c0_i32 = arith.constant 0 : i32
    %c0_i32_0 = arith.constant 0 : i32
    %c0_i32_1 = arith.constant 0 : i32
    %c0_i32_2 = arith.constant 0 : i32
    return %c0_i32, %c0_i32_0, %c0_i32_1 : i32, i32, i32
  }
  func.func @transform_3(%arg0: i32) -> (i32, i32, i32) {
    %c0_i32 = arith.constant 0 : i32
    %c0_i32_0 = arith.constant 0 : i32
    %c0_i32_1 = arith.constant 0 : i32
    %c0_i32_2 = arith.constant 0 : i32
    return %c0_i32, %c0_i32_0, %c0_i32_1 : i32, i32, i32
  }
  func.func @transform_4(%arg0: i32) -> (i32, i32, i32) {
    %c0_i32 = arith.constant 0 : i32
    %c0_i32_0 = arith.constant 0 : i32
    %c0_i32_1 = arith.constant 0 : i32
    %c0_i32_2 = arith.constant 0 : i32
    return %c0_i32, %c0_i32_0, %c0_i32_1 : i32, i32, i32
  }
  func.func @transform_5(%arg0: i32) -> (i32, i32, i32) {
    %c0_i32 = arith.constant 0 : i32
    %c0_i32_0 = arith.constant 0 : i32
    %c0_i32_1 = arith.constant 0 : i32
    %c0_i32_2 = arith.constant 0 : i32
    return %c0_i32, %c0_i32_0, %c0_i32_1 : i32, i32, i32
  }
  func.func @transform_6(%arg0: i32) -> (i32, i32) {
    %c0_i32 = arith.constant 0 : i32
    %c0_i32_0 = arith.constant 0 : i32
    %c0_i32_1 = arith.constant 0 : i32
    return %c0_i32, %c0_i32_0 : i32, i32
  }
  func.func @transform_7(%arg0: i32) -> (i32, i32) {
    %c0_i32 = arith.constant 0 : i32
    %c0_i32_0 = arith.constant 0 : i32
    %c0_i32_1 = arith.constant 0 : i32
    return %c0_i32, %c0_i32_0 : i32, i32
  }
  func.func @transform_8(%arg0: i32) -> (i32, i32) {
    %c0_i32 = arith.constant 0 : i32
    %c0_i32_0 = arith.constant 0 : i32
    %c0_i32_1 = arith.constant 0 : i32
    return %c0_i32, %c0_i32_0 : i32, i32
  }
  func.func @transform_9(%arg0: i32) -> (i32, i32) {
    %c0_i32 = arith.constant 0 : i32
    %c0_i32_0 = arith.constant 0 : i32
    %c0_i32_1 = arith.constant 0 : i32
    return %c0_i32, %c0_i32_0 : i32, i32
  }
  func.func @transform_10(%arg0: i32) -> (i32, i32) {
    %c0_i32 = arith.constant 0 : i32
    %c0_i32_0 = arith.constant 0 : i32
    %c0_i32_1 = arith.constant 0 : i32
    return %c0_i32, %c0_i32_0 : i32, i32
  }
  func.func @transform_11(%arg0: i32) -> (i32, i32) {
    %c0_i32 = arith.constant 0 : i32
    %c0_i32_0 = arith.constant 0 : i32
    %c0_i32_1 = arith.constant 0 : i32
    return %c0_i32, %c0_i32_0 : i32, i32
  }
  func.func @transform_12(%arg0: i32) -> (i32, i32) {
    %c0_i32 = arith.constant 0 : i32
    %c0_i32_0 = arith.constant 0 : i32
    %c0_i32_1 = arith.constant 0 : i32
    return %c0_i32, %c0_i32_0 : i32, i32
  }
  func.func @transform_13(%arg0: i32) -> (i32, i32) {
    %c0_i32 = arith.constant 0 : i32
    %c0_i32_0 = arith.constant 0 : i32
    %c0_i32_1 = arith.constant 0 : i32
    return %c0_i32, %c0_i32_0 : i32, i32
  }
  func.func @transform_14(%arg0: i32) -> (i32, i32) {
    %c0_i32 = arith.constant 0 : i32
    %c0_i32_0 = arith.constant 0 : i32
    %c0_i32_1 = arith.constant 0 : i32
    return %c0_i32, %c0_i32_0 : i32, i32
  }
  func.func @transform_15(%arg0: i32) -> (i32, i32, i32) {
    %c0_i32 = arith.constant 0 : i32
    %c0_i32_0 = arith.constant 0 : i32
    %c0_i32_1 = arith.constant 0 : i32
    return %arg0, %c0_i32, %c0_i32_0 : i32, i32, i32
  }
}

module attributes {stable_mosaic.version = 11 : i64} {
  func.func @_decoder_layer_kernel(%arg0: i32, %arg1: memref<1x8x32xf32, #tpu.memory_space<vmem>>, %arg2: memref<1x8x32xf32, #tpu.memory_space<vmem>>, %arg3: memref<1x1x8xf32, #tpu.memory_space<vmem>>, %arg4: memref<1x1x8xf32, #tpu.memory_space<vmem>>, %arg5: memref<4x32x8xbf16, #tpu.memory_space<vmem>>, %arg6: memref<4x32x8xbf16, #tpu.memory_space<vmem>>, %arg7: memref<4x32x8xbf16, #tpu.memory_space<vmem>>, %arg8: memref<4x8x32xbf16, #tpu.memory_space<vmem>>, %arg9: memref<1x32xf32, #tpu.memory_space<vmem>>, %arg10: memref<1x32xf32, #tpu.memory_space<vmem>>, %arg11: memref<1x32xf32, #tpu.memory_space<vmem>>, %arg12: memref<4x32x8xbf16, #tpu.memory_space<vmem>>, %arg13: memref<4x32x8xbf16, #tpu.memory_space<vmem>>, %arg14: memref<4x32x8xbf16, #tpu.memory_space<vmem>>, %arg15: memref<4x8x32xbf16, #tpu.memory_space<vmem>>, %arg16: memref<1x32xf32, #tpu.memory_space<vmem>>, %arg17: memref<1x32xf32, #tpu.memory_space<vmem>>, %arg18: memref<1x32xf32, #tpu.memory_space<vmem>>, %arg19: memref<32x128xbf16, #tpu.memory_space<vmem>>, %arg20: memref<1x128xf32, #tpu.memory_space<vmem>>, %arg21: memref<128x32xbf16, #tpu.memory_space<vmem>>, %arg22: memref<1x32xf32, #tpu.memory_space<vmem>>, %arg23: memref<1x32xf32, #tpu.memory_space<vmem>>, %arg24: memref<1x32xf32, #tpu.memory_space<vmem>>, %arg25: memref<1x8x32xf32, #tpu.memory_space<vmem>>) attributes {dimension_semantics = [#tpu.dimension_semantics<parallel>], iteration_bounds = array<i64: 2>, scalar_prefetch = 0 : i64, scratch_operands = 0 : i64, tpu.core_type = #tpu.core_type<tc>, window_params = [{transform_indices = @transform_0, window_bounds = array<i64: 1, 8, 32>}, {transform_indices = @transform_1, window_bounds = array<i64: 1, 8, 32>}, {transform_indices = @transform_2, window_bounds = array<i64: 1, 1, 8>}, {transform_indices = @transform_3, window_bounds = array<i64: 1, 1, 8>}, {pipeline_mode = #tpu.pipeline_mode<synchronous>, transform_indices = @transform_4, window_bounds = array<i64: 4, 32, 8>}, {pipeline_mode = #tpu.pipeline_mode<synchronous>, transform_indices = @transform_5, window_bounds = array<i64: 4, 32, 8>}, {pipeline_mode = #tpu.pipeline_mode<synchronous>, transform_indices = @transform_6, window_bounds = array<i64: 4, 32, 8>}, {pipeline_mode = #tpu.pipeline_mode<synchronous>, transform_indices = @transform_7, window_bounds = array<i64: 4, 8, 32>}, {pipeline_mode = #tpu.pipeline_mode<synchronous>, transform_indices = @transform_8, window_bounds = array<i64: 1, 32>}, {pipeline_mode = #tpu.pipeline_mode<synchronous>, transform_indices = @transform_9, window_bounds = array<i64: 1, 32>}, {pipeline_mode = #tpu.pipeline_mode<synchronous>, transform_indices = @transform_10, window_bounds = array<i64: 1, 32>}, {pipeline_mode = #tpu.pipeline_mode<synchronous>, transform_indices = @transform_11, window_bounds = array<i64: 4, 32, 8>}, {pipeline_mode = #tpu.pipeline_mode<synchronous>, transform_indices = @transform_12, window_bounds = array<i64: 4, 32, 8>}, {pipeline_mode = #tpu.pipeline_mode<synchronous>, transform_indices = @transform_13, window_bounds = array<i64: 4, 32, 8>}, {pipeline_mode = #tpu.pipeline_mode<synchronous>, transform_indices = @transform_14, window_bounds = array<i64: 4, 8, 32>}, {pipeline_mode = #tpu.pipeline_mode<synchronous>, transform_indices = @transform_15, window_bounds = array<i64: 1, 32>}, {pipeline_mode = #tpu.pipeline_mode<synchronous>, transform_indices = @transform_16, window_bounds = array<i64: 1, 32>}, {pipeline_mode = #tpu.pipeline_mode<synchronous>, transform_indices = @transform_17, window_bounds = array<i64: 1, 32>}, {pipeline_mode = #tpu.pipeline_mode<synchronous>, transform_indices = @transform_18, window_bounds = array<i64: 32, 128>}, {pipeline_mode = #tpu.pipeline_mode<synchronous>, transform_indices = @transform_19, window_bounds = array<i64: 1, 128>}, {pipeline_mode = #tpu.pipeline_mode<synchronous>, transform_indices = @transform_20, window_bounds = array<i64: 128, 32>}, {pipeline_mode = #tpu.pipeline_mode<synchronous>, transform_indices = @transform_21, window_bounds = array<i64: 1, 32>}, {pipeline_mode = #tpu.pipeline_mode<synchronous>, transform_indices = @transform_22, window_bounds = array<i64: 1, 32>}, {pipeline_mode = #tpu.pipeline_mode<synchronous>, transform_indices = @transform_23, window_bounds = array<i64: 1, 32>}, {transform_indices = @transform_24, window_bounds = array<i64: 1, 8, 32>}]} {
    %c0 = arith.constant 0 : index
    %c0_0 = arith.constant 0 : index
    %c0_1 = arith.constant 0 : index
    %0 = vector.load %arg1[%c0, %c0_0, %c0_1] : memref<1x8x32xf32, #tpu.memory_space<vmem>>, vector<1x8x32xf32>
    %1 = vector.shape_cast %0 : vector<1x8x32xf32> to vector<8x32xf32>
    %c0_2 = arith.constant 0 : index
    %c0_3 = arith.constant 0 : index
    %c0_4 = arith.constant 0 : index
    %2 = vector.load %arg2[%c0_2, %c0_3, %c0_4] : memref<1x8x32xf32, #tpu.memory_space<vmem>>, vector<1x8x32xf32>
    %3 = vector.shape_cast %2 : vector<1x8x32xf32> to vector<8x32xf32>
    %c0_5 = arith.constant 0 : index
    %c0_6 = arith.constant 0 : index
    %c0_7 = arith.constant 0 : index
    %4 = vector.load %arg3[%c0_5, %c0_6, %c0_7] : memref<1x1x8xf32, #tpu.memory_space<vmem>>, vector<1x1x8xf32>
    %5 = vector.shape_cast %4 : vector<1x1x8xf32> to vector<1x8xf32>
    %cst = arith.constant 5.000000e-01 : f32
    %6 = vector.broadcast %cst : f32 to vector<1x8xf32>
    %7 = arith.cmpf ogt, %5, %6 : vector<1x8xf32>
    %8 = vector.shape_cast %7 : vector<1x8xi1> to vector<1x8xi1>
    %9 = vector.broadcast %8 : vector<1x8xi1> to vector<8x8xi1>
    %10 = tpu.iota {dimensions = array<i32: 0>} : vector<8x8xi32>
    %11 = tpu.iota {dimensions = array<i32: 1>} : vector<8x8xi32>
    %12 = arith.cmpi sle, %11, %10 : vector<8x8xi32>
    %13 = arith.andi %9, %12 : vector<8x8xi1>
    %cst_8 = arith.constant 0.000000e+00 : f32
    %cst_9 = arith.constant -1.000000e+20 : f32
    %14 = vector.broadcast %cst_8 : f32 to vector<8x8xf32>
    %15 = vector.broadcast %cst_9 : f32 to vector<8x8xf32>
    %16 = arith.select %13, %14, %15 : vector<8x8xi1>, vector<8x8xf32>
    %c0_10 = arith.constant 0 : index
    %c0_11 = arith.constant 0 : index
    %c0_12 = arith.constant 0 : index
    %17 = vector.load %arg5[%c0_10, %c0_11, %c0_12] : memref<4x32x8xbf16, #tpu.memory_space<vmem>>, vector<4x32x8xbf16>
    %c0_13 = arith.constant 0 : index
    %c0_14 = arith.constant 0 : index
    %c0_15 = arith.constant 0 : index
    %18 = vector.load %arg6[%c0_13, %c0_14, %c0_15] : memref<4x32x8xbf16, #tpu.memory_space<vmem>>, vector<4x32x8xbf16>
    %c0_16 = arith.constant 0 : index
    %c0_17 = arith.constant 0 : index
    %c0_18 = arith.constant 0 : index
    %19 = vector.load %arg7[%c0_16, %c0_17, %c0_18] : memref<4x32x8xbf16, #tpu.memory_space<vmem>>, vector<4x32x8xbf16>
    %c0_19 = arith.constant 0 : index
    %c0_20 = arith.constant 0 : index
    %c0_21 = arith.constant 0 : index
    %20 = vector.load %arg8[%c0_19, %c0_20, %c0_21] : memref<4x8x32xbf16, #tpu.memory_space<vmem>>, vector<4x8x32xbf16>
    %c0_22 = arith.constant 0 : index
    %c0_23 = arith.constant 0 : index
    %21 = vector.load %arg9[%c0_22, %c0_23] : memref<1x32xf32, #tpu.memory_space<vmem>>, vector<1x32xf32>
    %22 = arith.truncf %1 : vector<8x32xf32> to vector<8x32xbf16>
    %23 = vector.shape_cast %22 : vector<8x32xbf16> to vector<1x8x32xbf16>
    %24 = vector.broadcast %23 : vector<1x8x32xbf16> to vector<4x8x32xbf16>
    "tpu.trace_start"() <{level = 10 : i32, message = "hle,hed->hld"}> : () -> ()
    %cst_24 = arith.constant dense<0.000000e+00> : vector<4x8x8xf32>
    %25 = tpu.matmul %24, %17, %cst_24 {dimension_numbers = #tpu.dot_dimension_numbers<[2], [1], [1], [2], [0, 0, 0, 1, 1, 2], [0], [0]>} : vector<4x8x32xbf16>, vector<4x32x8xbf16>, vector<4x8x8xf32> -> vector<4x8x8xf32>
    "tpu.trace_stop"() : () -> ()
    %26 = arith.truncf %25 : vector<4x8x8xf32> to vector<4x8x8xbf16>
    "tpu.trace_start"() <{level = 10 : i32, message = "hle,hed->hld"}> : () -> ()
    %cst_25 = arith.constant dense<0.000000e+00> : vector<4x8x8xf32>
    %27 = tpu.matmul %24, %18, %cst_25 {dimension_numbers = #tpu.dot_dimension_numbers<[2], [1], [1], [2], [0, 0, 0, 1, 1, 2], [0], [0]>} : vector<4x8x32xbf16>, vector<4x32x8xbf16>, vector<4x8x8xf32> -> vector<4x8x8xf32>
    "tpu.trace_stop"() : () -> ()
    %28 = arith.truncf %27 : vector<4x8x8xf32> to vector<4x8x8xbf16>
    "tpu.trace_start"() <{level = 10 : i32, message = "hle,hed->hld"}> : () -> ()
    %cst_26 = arith.constant dense<0.000000e+00> : vector<4x8x8xf32>
    %29 = tpu.matmul %24, %19, %cst_26 {dimension_numbers = #tpu.dot_dimension_numbers<[2], [1], [1], [2], [0, 0, 0, 1, 1, 2], [0], [0]>} : vector<4x8x32xbf16>, vector<4x32x8xbf16>, vector<4x8x8xf32> -> vector<4x8x8xf32>
    "tpu.trace_stop"() : () -> ()
    %30 = arith.truncf %29 : vector<4x8x8xf32> to vector<4x8x8xbf16>
    "tpu.trace_start"() <{level = 10 : i32, message = "hqd,hkd->hqk"}> : () -> ()
    %cst_27 = arith.constant dense<0.000000e+00> : vector<4x8x8xf32>
    %31 = tpu.matmul %26, %28, %cst_27 {dimension_numbers = #tpu.dot_dimension_numbers<[2], [2], [1], [1], [0, 0, 0, 1, 1, 1], [0], [0]>} : vector<4x8x8xbf16>, vector<4x8x8xbf16>, vector<4x8x8xf32> -> vector<4x8x8xf32>
    "tpu.trace_stop"() : () -> ()
    %32 = vector.shape_cast %16 : vector<8x8xf32> to vector<1x8x8xf32>
    %33 = vector.broadcast %32 : vector<1x8x8xf32> to vector<4x8x8xf32>
    %34 = arith.addf %31, %33 : vector<4x8x8xf32>
    %cst_28 = arith.constant dense<0xFF800000> : vector<4x8xf32>
    %35 = vector.multi_reduction <maximumf>, %34, %cst_28 [2] : vector<4x8x8xf32> to vector<4x8xf32>
    %36 = vector.shape_cast %35 : vector<4x8xf32> to vector<4x8x1xf32>
    %37 = vector.broadcast %36 : vector<4x8x1xf32> to vector<4x8x8xf32>
    %38 = arith.subf %34, %37 : vector<4x8x8xf32>
    %39 = math.exp %38 : vector<4x8x8xf32>
    %cst_29 = arith.constant dense<0.000000e+00> : vector<4x8xf32>
    %40 = vector.multi_reduction <add>, %39, %cst_29 [2] : vector<4x8x8xf32> to vector<4x8xf32>
    %41 = vector.shape_cast %40 : vector<4x8xf32> to vector<4x8x1xf32>
    %42 = tpu.reciprocal %41 {approx = true} : vector<4x8x1xf32> -> vector<4x8x1xf32>
    %43 = vector.broadcast %42 : vector<4x8x1xf32> to vector<4x8x8xf32>
    %44 = arith.mulf %39, %43 : vector<4x8x8xf32>
    %45 = arith.truncf %44 : vector<4x8x8xf32> to vector<4x8x8xbf16>
    "tpu.trace_start"() <{level = 10 : i32, message = "hqk,hkd->hqd"}> : () -> ()
    %cst_30 = arith.constant dense<0.000000e+00> : vector<4x8x8xf32>
    %46 = tpu.matmul %45, %30, %cst_30 {dimension_numbers = #tpu.dot_dimension_numbers<[2], [1], [1], [2], [0, 0, 0, 1, 1, 2], [0], [0]>} : vector<4x8x8xbf16>, vector<4x8x8xbf16>, vector<4x8x8xf32> -> vector<4x8x8xf32>
    "tpu.trace_stop"() : () -> ()
    %47 = arith.truncf %46 : vector<4x8x8xf32> to vector<4x8x8xbf16>
    "tpu.trace_start"() <{level = 10 : i32, message = "hqd,hde->hqe"}> : () -> ()
    %cst_31 = arith.constant dense<0.000000e+00> : vector<4x8x32xf32>
    %48 = tpu.matmul %47, %20, %cst_31 {dimension_numbers = #tpu.dot_dimension_numbers<[2], [1], [1], [2], [0, 0, 0, 1, 1, 2], [0], [0]>} : vector<4x8x8xbf16>, vector<4x8x32xbf16>, vector<4x8x32xf32> -> vector<4x8x32xf32>
    "tpu.trace_stop"() : () -> ()
    %cst_32 = arith.constant dense<0.000000e+00> : vector<8x32xf32>
    %49 = vector.multi_reduction <add>, %48, %cst_32 [0] : vector<4x8x32xf32> to vector<8x32xf32>
    %50 = vector.broadcast %21 : vector<1x32xf32> to vector<8x32xf32>
    %51 = arith.addf %49, %50 : vector<8x32xf32>
    %52 = arith.addf %51, %1 : vector<8x32xf32>
    %c0_33 = arith.constant 0 : index
    %c0_34 = arith.constant 0 : index
    %53 = vector.load %arg10[%c0_33, %c0_34] : memref<1x32xf32, #tpu.memory_space<vmem>>, vector<1x32xf32>
    %c0_35 = arith.constant 0 : index
    %c0_36 = arith.constant 0 : index
    %54 = vector.load %arg11[%c0_35, %c0_36] : memref<1x32xf32, #tpu.memory_space<vmem>>, vector<1x32xf32>
    %cst_37 = arith.constant dense<0.000000e+00> : vector<8xf32>
    %55 = vector.multi_reduction <add>, %52, %cst_37 [1] : vector<8x32xf32> to vector<8xf32>
    %56 = vector.shape_cast %55 : vector<8xf32> to vector<8x1xf32>
    %cst_38 = arith.constant 3.200000e+01 : f32
    %57 = vector.broadcast %cst_38 : f32 to vector<8x1xf32>
    %58 = arith.divf %56, %57 : vector<8x1xf32>
    %59 = vector.broadcast %58 : vector<8x1xf32> to vector<8x32xf32>
    %60 = arith.subf %52, %59 : vector<8x32xf32>
    %61 = arith.mulf %60, %60 : vector<8x32xf32>
    %cst_39 = arith.constant dense<0.000000e+00> : vector<8xf32>
    %62 = vector.multi_reduction <add>, %61, %cst_39 [1] : vector<8x32xf32> to vector<8xf32>
    %63 = vector.shape_cast %62 : vector<8xf32> to vector<8x1xf32>
    %cst_40 = arith.constant 3.200000e+01 : f32
    %64 = vector.broadcast %cst_40 : f32 to vector<8x1xf32>
    %65 = arith.divf %63, %64 : vector<8x1xf32>
    %66 = vector.broadcast %58 : vector<8x1xf32> to vector<8x32xf32>
    %67 = arith.subf %52, %66 : vector<8x32xf32>
    %cst_41 = arith.constant 9.99999974E-6 : f32
    %68 = vector.broadcast %cst_41 : f32 to vector<8x1xf32>
    %69 = arith.addf %65, %68 : vector<8x1xf32>
    %70 = math.rsqrt %69 : vector<8x1xf32>
    %71 = vector.broadcast %70 : vector<8x1xf32> to vector<8x32xf32>
    %72 = arith.mulf %67, %71 : vector<8x32xf32>
    %73 = vector.broadcast %53 : vector<1x32xf32> to vector<8x32xf32>
    %74 = arith.mulf %72, %73 : vector<8x32xf32>
    %75 = vector.broadcast %54 : vector<1x32xf32> to vector<8x32xf32>
    %76 = arith.addf %74, %75 : vector<8x32xf32>
    %c0_42 = arith.constant 0 : index
    %c0_43 = arith.constant 0 : index
    %c0_44 = arith.constant 0 : index
    %77 = vector.load %arg4[%c0_42, %c0_43, %c0_44] : memref<1x1x8xf32, #tpu.memory_space<vmem>>, vector<1x1x8xf32>
    %78 = vector.shape_cast %77 : vector<1x1x8xf32> to vector<1x8xf32>
    %cst_45 = arith.constant 5.000000e-01 : f32
    %79 = vector.broadcast %cst_45 : f32 to vector<1x8xf32>
    %80 = arith.cmpf ogt, %78, %79 : vector<1x8xf32>
    %81 = vector.shape_cast %80 : vector<1x8xi1> to vector<1x8xi1>
    %82 = vector.broadcast %81 : vector<1x8xi1> to vector<8x8xi1>
    %cst_46 = arith.constant 0.000000e+00 : f32
    %cst_47 = arith.constant -1.000000e+20 : f32
    %83 = vector.broadcast %cst_46 : f32 to vector<8x8xf32>
    %84 = vector.broadcast %cst_47 : f32 to vector<8x8xf32>
    %85 = arith.select %82, %83, %84 : vector<8x8xi1>, vector<8x8xf32>
    %c0_48 = arith.constant 0 : index
    %c0_49 = arith.constant 0 : index
    %c0_50 = arith.constant 0 : index
    %86 = vector.load %arg12[%c0_48, %c0_49, %c0_50] : memref<4x32x8xbf16, #tpu.memory_space<vmem>>, vector<4x32x8xbf16>
    %c0_51 = arith.constant 0 : index
    %c0_52 = arith.constant 0 : index
    %c0_53 = arith.constant 0 : index
    %87 = vector.load %arg13[%c0_51, %c0_52, %c0_53] : memref<4x32x8xbf16, #tpu.memory_space<vmem>>, vector<4x32x8xbf16>
    %c0_54 = arith.constant 0 : index
    %c0_55 = arith.constant 0 : index
    %c0_56 = arith.constant 0 : index
    %88 = vector.load %arg14[%c0_54, %c0_55, %c0_56] : memref<4x32x8xbf16, #tpu.memory_space<vmem>>, vector<4x32x8xbf16>
    %c0_57 = arith.constant 0 : index
    %c0_58 = arith.constant 0 : index
    %c0_59 = arith.constant 0 : index
    %89 = vector.load %arg15[%c0_57, %c0_58, %c0_59] : memref<4x8x32xbf16, #tpu.memory_space<vmem>>, vector<4x8x32xbf16>
    %c0_60 = arith.constant 0 : index
    %c0_61 = arith.constant 0 : index
    %90 = vector.load %arg16[%c0_60, %c0_61] : memref<1x32xf32, #tpu.memory_space<vmem>>, vector<1x32xf32>
    %91 = arith.truncf %76 : vector<8x32xf32> to vector<8x32xbf16>
    %92 = vector.shape_cast %91 : vector<8x32xbf16> to vector<1x8x32xbf16>
    %93 = vector.broadcast %92 : vector<1x8x32xbf16> to vector<4x8x32xbf16>
    %94 = arith.truncf %3 : vector<8x32xf32> to vector<8x32xbf16>
    %95 = vector.shape_cast %94 : vector<8x32xbf16> to vector<1x8x32xbf16>
    %96 = vector.broadcast %95 : vector<1x8x32xbf16> to vector<4x8x32xbf16>
    "tpu.trace_start"() <{level = 10 : i32, message = "hle,hed->hld"}> : () -> ()
    %cst_62 = arith.constant dense<0.000000e+00> : vector<4x8x8xf32>
    %97 = tpu.matmul %93, %86, %cst_62 {dimension_numbers = #tpu.dot_dimension_numbers<[2], [1], [1], [2], [0, 0, 0, 1, 1, 2], [0], [0]>} : vector<4x8x32xbf16>, vector<4x32x8xbf16>, vector<4x8x8xf32> -> vector<4x8x8xf32>
    "tpu.trace_stop"() : () -> ()
    %98 = arith.truncf %97 : vector<4x8x8xf32> to vector<4x8x8xbf16>
    "tpu.trace_start"() <{level = 10 : i32, message = "hle,hed->hld"}> : () -> ()
    %cst_63 = arith.constant dense<0.000000e+00> : vector<4x8x8xf32>
    %99 = tpu.matmul %96, %87, %cst_63 {dimension_numbers = #tpu.dot_dimension_numbers<[2], [1], [1], [2], [0, 0, 0, 1, 1, 2], [0], [0]>} : vector<4x8x32xbf16>, vector<4x32x8xbf16>, vector<4x8x8xf32> -> vector<4x8x8xf32>
    "tpu.trace_stop"() : () -> ()
    %100 = arith.truncf %99 : vector<4x8x8xf32> to vector<4x8x8xbf16>
    "tpu.trace_start"() <{level = 10 : i32, message = "hle,hed->hld"}> : () -> ()
    %cst_64 = arith.constant dense<0.000000e+00> : vector<4x8x8xf32>
    %101 = tpu.matmul %96, %88, %cst_64 {dimension_numbers = #tpu.dot_dimension_numbers<[2], [1], [1], [2], [0, 0, 0, 1, 1, 2], [0], [0]>} : vector<4x8x32xbf16>, vector<4x32x8xbf16>, vector<4x8x8xf32> -> vector<4x8x8xf32>
    "tpu.trace_stop"() : () -> ()
    %102 = arith.truncf %101 : vector<4x8x8xf32> to vector<4x8x8xbf16>
    "tpu.trace_start"() <{level = 10 : i32, message = "hqd,hkd->hqk"}> : () -> ()
    %cst_65 = arith.constant dense<0.000000e+00> : vector<4x8x8xf32>
    %103 = tpu.matmul %98, %100, %cst_65 {dimension_numbers = #tpu.dot_dimension_numbers<[2], [2], [1], [1], [0, 0, 0, 1, 1, 1], [0], [0]>} : vector<4x8x8xbf16>, vector<4x8x8xbf16>, vector<4x8x8xf32> -> vector<4x8x8xf32>
    "tpu.trace_stop"() : () -> ()
    %104 = vector.shape_cast %85 : vector<8x8xf32> to vector<1x8x8xf32>
    %105 = vector.broadcast %104 : vector<1x8x8xf32> to vector<4x8x8xf32>
    %106 = arith.addf %103, %105 : vector<4x8x8xf32>
    %cst_66 = arith.constant dense<0xFF800000> : vector<4x8xf32>
    %107 = vector.multi_reduction <maximumf>, %106, %cst_66 [2] : vector<4x8x8xf32> to vector<4x8xf32>
    %108 = vector.shape_cast %107 : vector<4x8xf32> to vector<4x8x1xf32>
    %109 = vector.broadcast %108 : vector<4x8x1xf32> to vector<4x8x8xf32>
    %110 = arith.subf %106, %109 : vector<4x8x8xf32>
    %111 = math.exp %110 : vector<4x8x8xf32>
    %cst_67 = arith.constant dense<0.000000e+00> : vector<4x8xf32>
    %112 = vector.multi_reduction <add>, %111, %cst_67 [2] : vector<4x8x8xf32> to vector<4x8xf32>
    %113 = vector.shape_cast %112 : vector<4x8xf32> to vector<4x8x1xf32>
    %114 = tpu.reciprocal %113 {approx = true} : vector<4x8x1xf32> -> vector<4x8x1xf32>
    %115 = vector.broadcast %114 : vector<4x8x1xf32> to vector<4x8x8xf32>
    %116 = arith.mulf %111, %115 : vector<4x8x8xf32>
    %117 = arith.truncf %116 : vector<4x8x8xf32> to vector<4x8x8xbf16>
    "tpu.trace_start"() <{level = 10 : i32, message = "hqk,hkd->hqd"}> : () -> ()
    %cst_68 = arith.constant dense<0.000000e+00> : vector<4x8x8xf32>
    %118 = tpu.matmul %117, %102, %cst_68 {dimension_numbers = #tpu.dot_dimension_numbers<[2], [1], [1], [2], [0, 0, 0, 1, 1, 2], [0], [0]>} : vector<4x8x8xbf16>, vector<4x8x8xbf16>, vector<4x8x8xf32> -> vector<4x8x8xf32>
    "tpu.trace_stop"() : () -> ()
    %119 = arith.truncf %118 : vector<4x8x8xf32> to vector<4x8x8xbf16>
    "tpu.trace_start"() <{level = 10 : i32, message = "hqd,hde->hqe"}> : () -> ()
    %cst_69 = arith.constant dense<0.000000e+00> : vector<4x8x32xf32>
    %120 = tpu.matmul %119, %89, %cst_69 {dimension_numbers = #tpu.dot_dimension_numbers<[2], [1], [1], [2], [0, 0, 0, 1, 1, 2], [0], [0]>} : vector<4x8x8xbf16>, vector<4x8x32xbf16>, vector<4x8x32xf32> -> vector<4x8x32xf32>
    "tpu.trace_stop"() : () -> ()
    %cst_70 = arith.constant dense<0.000000e+00> : vector<8x32xf32>
    %121 = vector.multi_reduction <add>, %120, %cst_70 [0] : vector<4x8x32xf32> to vector<8x32xf32>
    %122 = vector.broadcast %90 : vector<1x32xf32> to vector<8x32xf32>
    %123 = arith.addf %121, %122 : vector<8x32xf32>
    %124 = arith.addf %123, %76 : vector<8x32xf32>
    %c0_71 = arith.constant 0 : index
    %c0_72 = arith.constant 0 : index
    %125 = vector.load %arg17[%c0_71, %c0_72] : memref<1x32xf32, #tpu.memory_space<vmem>>, vector<1x32xf32>
    %c0_73 = arith.constant 0 : index
    %c0_74 = arith.constant 0 : index
    %126 = vector.load %arg18[%c0_73, %c0_74] : memref<1x32xf32, #tpu.memory_space<vmem>>, vector<1x32xf32>
    %cst_75 = arith.constant dense<0.000000e+00> : vector<8xf32>
    %127 = vector.multi_reduction <add>, %124, %cst_75 [1] : vector<8x32xf32> to vector<8xf32>
    %128 = vector.shape_cast %127 : vector<8xf32> to vector<8x1xf32>
    %cst_76 = arith.constant 3.200000e+01 : f32
    %129 = vector.broadcast %cst_76 : f32 to vector<8x1xf32>
    %130 = arith.divf %128, %129 : vector<8x1xf32>
    %131 = vector.broadcast %130 : vector<8x1xf32> to vector<8x32xf32>
    %132 = arith.subf %124, %131 : vector<8x32xf32>
    %133 = arith.mulf %132, %132 : vector<8x32xf32>
    %cst_77 = arith.constant dense<0.000000e+00> : vector<8xf32>
    %134 = vector.multi_reduction <add>, %133, %cst_77 [1] : vector<8x32xf32> to vector<8xf32>
    %135 = vector.shape_cast %134 : vector<8xf32> to vector<8x1xf32>
    %cst_78 = arith.constant 3.200000e+01 : f32
    %136 = vector.broadcast %cst_78 : f32 to vector<8x1xf32>
    %137 = arith.divf %135, %136 : vector<8x1xf32>
    %138 = vector.broadcast %130 : vector<8x1xf32> to vector<8x32xf32>
    %139 = arith.subf %124, %138 : vector<8x32xf32>
    %cst_79 = arith.constant 9.99999974E-6 : f32
    %140 = vector.broadcast %cst_79 : f32 to vector<8x1xf32>
    %141 = arith.addf %137, %140 : vector<8x1xf32>
    %142 = math.rsqrt %141 : vector<8x1xf32>
    %143 = vector.broadcast %142 : vector<8x1xf32> to vector<8x32xf32>
    %144 = arith.mulf %139, %143 : vector<8x32xf32>
    %145 = vector.broadcast %125 : vector<1x32xf32> to vector<8x32xf32>
    %146 = arith.mulf %144, %145 : vector<8x32xf32>
    %147 = vector.broadcast %126 : vector<1x32xf32> to vector<8x32xf32>
    %148 = arith.addf %146, %147 : vector<8x32xf32>
    %c0_80 = arith.constant 0 : index
    %c0_81 = arith.constant 0 : index
    %149 = vector.load %arg19[%c0_80, %c0_81] : memref<32x128xbf16, #tpu.memory_space<vmem>>, vector<32x128xbf16>
    %c0_82 = arith.constant 0 : index
    %c0_83 = arith.constant 0 : index
    %150 = vector.load %arg20[%c0_82, %c0_83] : memref<1x128xf32, #tpu.memory_space<vmem>>, vector<1x128xf32>
    %c0_84 = arith.constant 0 : index
    %c0_85 = arith.constant 0 : index
    %151 = vector.load %arg21[%c0_84, %c0_85] : memref<128x32xbf16, #tpu.memory_space<vmem>>, vector<128x32xbf16>
    %c0_86 = arith.constant 0 : index
    %c0_87 = arith.constant 0 : index
    %152 = vector.load %arg22[%c0_86, %c0_87] : memref<1x32xf32, #tpu.memory_space<vmem>>, vector<1x32xf32>
    %153 = arith.truncf %148 : vector<8x32xf32> to vector<8x32xbf16>
    %cst_88 = arith.constant dense<0.000000e+00> : vector<8x128xf32>
    %154 = tpu.matmul %153, %149, %cst_88 {dimension_numbers = #tpu.dot_dimension_numbers<[1], [0], [0], [1], [0, 0, 1, 1], [], []>} : vector<8x32xbf16>, vector<32x128xbf16>, vector<8x128xf32> -> vector<8x128xf32>
    %155 = vector.broadcast %150 : vector<1x128xf32> to vector<8x128xf32>
    %156 = arith.addf %154, %155 : vector<8x128xf32>
    %cst_89 = arith.constant 0.000000e+00 : f32
    %157 = vector.broadcast %cst_89 : f32 to vector<8x128xf32>
    %158 = arith.maximumf %156, %157 : vector<8x128xf32>
    %159 = arith.truncf %158 : vector<8x128xf32> to vector<8x128xbf16>
    %cst_90 = arith.constant dense<0.000000e+00> : vector<8x32xf32>
    %160 = tpu.matmul %159, %151, %cst_90 {dimension_numbers = #tpu.dot_dimension_numbers<[1], [0], [0], [1], [0, 0, 1, 1], [], []>} : vector<8x128xbf16>, vector<128x32xbf16>, vector<8x32xf32> -> vector<8x32xf32>
    %161 = vector.broadcast %152 : vector<1x32xf32> to vector<8x32xf32>
    %162 = arith.addf %160, %161 : vector<8x32xf32>
    %163 = arith.addf %162, %148 : vector<8x32xf32>
    %c0_91 = arith.constant 0 : index
    %c0_92 = arith.constant 0 : index
    %164 = vector.load %arg23[%c0_91, %c0_92] : memref<1x32xf32, #tpu.memory_space<vmem>>, vector<1x32xf32>
    %c0_93 = arith.constant 0 : index
    %c0_94 = arith.constant 0 : index
    %165 = vector.load %arg24[%c0_93, %c0_94] : memref<1x32xf32, #tpu.memory_space<vmem>>, vector<1x32xf32>
    %cst_95 = arith.constant dense<0.000000e+00> : vector<8xf32>
    %166 = vector.multi_reduction <add>, %163, %cst_95 [1] : vector<8x32xf32> to vector<8xf32>
    %167 = vector.shape_cast %166 : vector<8xf32> to vector<8x1xf32>
    %cst_96 = arith.constant 3.200000e+01 : f32
    %168 = vector.broadcast %cst_96 : f32 to vector<8x1xf32>
    %169 = arith.divf %167, %168 : vector<8x1xf32>
    %170 = vector.broadcast %169 : vector<8x1xf32> to vector<8x32xf32>
    %171 = arith.subf %163, %170 : vector<8x32xf32>
    %172 = arith.mulf %171, %171 : vector<8x32xf32>
    %cst_97 = arith.constant dense<0.000000e+00> : vector<8xf32>
    %173 = vector.multi_reduction <add>, %172, %cst_97 [1] : vector<8x32xf32> to vector<8xf32>
    %174 = vector.shape_cast %173 : vector<8xf32> to vector<8x1xf32>
    %cst_98 = arith.constant 3.200000e+01 : f32
    %175 = vector.broadcast %cst_98 : f32 to vector<8x1xf32>
    %176 = arith.divf %174, %175 : vector<8x1xf32>
    %177 = vector.broadcast %169 : vector<8x1xf32> to vector<8x32xf32>
    %178 = arith.subf %163, %177 : vector<8x32xf32>
    %cst_99 = arith.constant 9.99999974E-6 : f32
    %179 = vector.broadcast %cst_99 : f32 to vector<8x1xf32>
    %180 = arith.addf %176, %179 : vector<8x1xf32>
    %181 = math.rsqrt %180 : vector<8x1xf32>
    %182 = vector.broadcast %181 : vector<8x1xf32> to vector<8x32xf32>
    %183 = arith.mulf %178, %182 : vector<8x32xf32>
    %184 = vector.broadcast %164 : vector<1x32xf32> to vector<8x32xf32>
    %185 = arith.mulf %183, %184 : vector<8x32xf32>
    %186 = vector.broadcast %165 : vector<1x32xf32> to vector<8x32xf32>
    %187 = arith.addf %185, %186 : vector<8x32xf32>
    %c0_100 = arith.constant 0 : index
    %c0_101 = arith.constant 0 : index
    %c0_102 = arith.constant 0 : index
    %188 = vector.load %arg25[%c0_100, %c0_101, %c0_102] : memref<1x8x32xf32, #tpu.memory_space<vmem>>, vector<1x8x32xf32>
    %189 = vector.shape_cast %188 : vector<1x8x32xf32> to vector<8x32xf32>
    %190 = vector.shape_cast %187 : vector<8x32xf32> to vector<1x8x32xf32>
    tpu.vector_store %arg25[%c0_100, %c0_101, %c0_102], %190 {strides = array<i32>} : memref<1x8x32xf32, #tpu.memory_space<vmem>>, vector<1x8x32xf32>,
    return
  }
  func.func @transform_0(%arg0: i32) -> (i32, i32, i32) {
    %c0_i32 = arith.constant 0 : i32
    %c0_i32_0 = arith.constant 0 : i32
    %c0_i32_1 = arith.constant 0 : i32
    return %arg0, %c0_i32, %c0_i32_0 : i32, i32, i32
  }
  func.func @transform_1(%arg0: i32) -> (i32, i32, i32) {
    %c0_i32 = arith.constant 0 : i32
    %c0_i32_0 = arith.constant 0 : i32
    %c0_i32_1 = arith.constant 0 : i32
    return %arg0, %c0_i32, %c0_i32_0 : i32, i32, i32
  }
  func.func @transform_2(%arg0: i32) -> (i32, i32, i32) {
    %c0_i32 = arith.constant 0 : i32
    %c0_i32_0 = arith.constant 0 : i32
    %c0_i32_1 = arith.constant 0 : i32
    return %arg0, %c0_i32, %c0_i32_0 : i32, i32, i32
  }
  func.func @transform_3(%arg0: i32) -> (i32, i32, i32) {
    %c0_i32 = arith.constant 0 : i32
    %c0_i32_0 = arith.constant 0 : i32
    %c0_i32_1 = arith.constant 0 : i32
    return %arg0, %c0_i32, %c0_i32_0 : i32, i32, i32
  }
  func.func @transform_4(%arg0: i32) -> (i32, i32, i32) {
    %c0_i32 = arith.constant 0 : i32
    %c0_i32_0 = arith.constant 0 : i32
    %c0_i32_1 = arith.constant 0 : i32
    %c0_i32_2 = arith.constant 0 : i32
    return %c0_i32, %c0_i32_0, %c0_i32_1 : i32, i32, i32
  }
  func.func @transform_5(%arg0: i32) -> (i32, i32, i32) {
    %c0_i32 = arith.constant 0 : i32
    %c0_i32_0 = arith.constant 0 : i32
    %c0_i32_1 = arith.constant 0 : i32
    %c0_i32_2 = arith.constant 0 : i32
    return %c0_i32, %c0_i32_0, %c0_i32_1 : i32, i32, i32
  }
  func.func @transform_6(%arg0: i32) -> (i32, i32, i32) {
    %c0_i32 = arith.constant 0 : i32
    %c0_i32_0 = arith.constant 0 : i32
    %c0_i32_1 = arith.constant 0 : i32
    %c0_i32_2 = arith.constant 0 : i32
    return %c0_i32, %c0_i32_0, %c0_i32_1 : i32, i32, i32
  }
  func.func @transform_7(%arg0: i32) -> (i32, i32, i32) {
    %c0_i32 = arith.constant 0 : i32
    %c0_i32_0 = arith.constant 0 : i32
    %c0_i32_1 = arith.constant 0 : i32
    %c0_i32_2 = arith.constant 0 : i32
    return %c0_i32, %c0_i32_0, %c0_i32_1 : i32, i32, i32
  }
  func.func @transform_8(%arg0: i32) -> (i32, i32) {
    %c0_i32 = arith.constant 0 : i32
    %c0_i32_0 = arith.constant 0 : i32
    %c0_i32_1 = arith.constant 0 : i32
    return %c0_i32, %c0_i32_0 : i32, i32
  }
  func.func @transform_9(%arg0: i32) -> (i32, i32) {
    %c0_i32 = arith.constant 0 : i32
    %c0_i32_0 = arith.constant 0 : i32
    %c0_i32_1 = arith.constant 0 : i32
    return %c0_i32, %c0_i32_0 : i32, i32
  }
  func.func @transform_10(%arg0: i32) -> (i32, i32) {
    %c0_i32 = arith.constant 0 : i32
    %c0_i32_0 = arith.constant 0 : i32
    %c0_i32_1 = arith.constant 0 : i32
    return %c0_i32, %c0_i32_0 : i32, i32
  }
  func.func @transform_11(%arg0: i32) -> (i32, i32, i32) {
    %c0_i32 = arith.constant 0 : i32
    %c0_i32_0 = arith.constant 0 : i32
    %c0_i32_1 = arith.constant 0 : i32
    %c0_i32_2 = arith.constant 0 : i32
    return %c0_i32, %c0_i32_0, %c0_i32_1 : i32, i32, i32
  }
  func.func @transform_12(%arg0: i32) -> (i32, i32, i32) {
    %c0_i32 = arith.constant 0 : i32
    %c0_i32_0 = arith.constant 0 : i32
    %c0_i32_1 = arith.constant 0 : i32
    %c0_i32_2 = arith.constant 0 : i32
    return %c0_i32, %c0_i32_0, %c0_i32_1 : i32, i32, i32
  }
  func.func @transform_13(%arg0: i32) -> (i32, i32, i32) {
    %c0_i32 = arith.constant 0 : i32
    %c0_i32_0 = arith.constant 0 : i32
    %c0_i32_1 = arith.constant 0 : i32
    %c0_i32_2 = arith.constant 0 : i32
    return %c0_i32, %c0_i32_0, %c0_i32_1 : i32, i32, i32
  }
  func.func @transform_14(%arg0: i32) -> (i32, i32, i32) {
    %c0_i32 = arith.constant 0 : i32
    %c0_i32_0 = arith.constant 0 : i32
    %c0_i32_1 = arith.constant 0 : i32
    %c0_i32_2 = arith.constant 0 : i32
    return %c0_i32, %c0_i32_0, %c0_i32_1 : i32, i32, i32
  }
  func.func @transform_15(%arg0: i32) -> (i32, i32) {
    %c0_i32 = arith.constant 0 : i32
    %c0_i32_0 = arith.constant 0 : i32
    %c0_i32_1 = arith.constant 0 : i32
    return %c0_i32, %c0_i32_0 : i32, i32
  }
  func.func @transform_16(%arg0: i32) -> (i32, i32) {
    %c0_i32 = arith.constant 0 : i32
    %c0_i32_0 = arith.constant 0 : i32
    %c0_i32_1 = arith.constant 0 : i32
    return %c0_i32, %c0_i32_0 : i32, i32
  }
  func.func @transform_17(%arg0: i32) -> (i32, i32) {
    %c0_i32 = arith.constant 0 : i32
    %c0_i32_0 = arith.constant 0 : i32
    %c0_i32_1 = arith.constant 0 : i32
    return %c0_i32, %c0_i32_0 : i32, i32
  }
  func.func @transform_18(%arg0: i32) -> (i32, i32) {
    %c0_i32 = arith.constant 0 : i32
    %c0_i32_0 = arith.constant 0 : i32
    %c0_i32_1 = arith.constant 0 : i32
    return %c0_i32, %c0_i32_0 : i32, i32
  }
  func.func @transform_19(%arg0: i32) -> (i32, i32) {
    %c0_i32 = arith.constant 0 : i32
    %c0_i32_0 = arith.constant 0 : i32
    %c0_i32_1 = arith.constant 0 : i32
    return %c0_i32, %c0_i32_0 : i32, i32
  }
  func.func @transform_20(%arg0: i32) -> (i32, i32) {
    %c0_i32 = arith.constant 0 : i32
    %c0_i32_0 = arith.constant 0 : i32
    %c0_i32_1 = arith.constant 0 : i32
    return %c0_i32, %c0_i32_0 : i32, i32
  }
  func.func @transform_21(%arg0: i32) -> (i32, i32) {
    %c0_i32 = arith.constant 0 : i32
    %c0_i32_0 = arith.constant 0 : i32
    %c0_i32_1 = arith.constant 0 : i32
    return %c0_i32, %c0_i32_0 : i32, i32
  }
  func.func @transform_22(%arg0: i32) -> (i32, i32) {
    %c0_i32 = arith.constant 0 : i32
    %c0_i32_0 = arith.constant 0 : i32
    %c0_i32_1 = arith.constant 0 : i32
    return %c0_i32, %c0_i32_0 : i32, i32
  }
  func.func @transform_23(%arg0: i32) -> (i32, i32) {
    %c0_i32 = arith.constant 0 : i32
    %c0_i32_0 = arith.constant 0 : i32
    %c0_i32_1 = arith.constant 0 : i32
    return %c0_i32, %c0_i32_0 : i32, i32
  }
  func.func @transform_24(%arg0: i32) -> (i32, i32, i32) {
    %c0_i32 = arith.constant 0 : i32
    %c0_i32_0 = arith.constant 0 : i32
    %c0_i32_1 = arith.constant 0 : i32
    return %arg0, %c0_i32, %c0_i32_0 : i32, i32, i32
  }
}

</mosaic_0001>

<bundles_post_ra>
// kernel: transformer_fwd.9
= control target key start
LH: loop header
LB: loop body
LE: loop exit
PB: predicated region body
PF: predicated region fallthrough
CT: control target
= control target key end

     0   :  { %s448_s12 = smov 0   ;;  %s450_s13 = smov 0   ;;  %s487_s0 = inlined_call_operand.vmem [shape: f32[16,32], index: 0, kind: input, shape index: {}]   ;;  %s488_s1 = inlined_call_operand.vmem [shape: bf16[32,128], index: 1, kind: input, shape index: {}]   ;;  %s489_s2 = inlined_call_operand.vmem [shape: f32[1,128], index: 2, kind: input, shape index: {}]   ;;  %s490_s3 = inlined_call_operand.vmem [shape: f32[16,128], index: 3, kind: output, shape index: {}]  }
   0x1   :  { %s452_s14 = smov 0  }
   0x2 LB: > { %s25_s15 = sadd.s32 1, %s422_s13  ;;  %p363_p0 = scmp.ge.s32.totalorder %s426_s14, 1  ;;  %s426_s14 = sphi %s452_s14, %s13_s14   ;;  %s422_s13 = sphi %s450_s13, %s492_s13   ;;  %s418_s12 = sphi %s448_s12, %s491_s12  }
   0x3   : > { %p27_p1 = scmp.ge.s32.totalorder %s25_s15, 2  ;;  %p167_p2 = scmp.lt.s32.totalorder %s426_s14, 3 }
   0x5   : > { %s494_s15 = smov (%p27_p1, %s25_s15), 0  ;;  %p168_p3 = pnand %p363_p0, %p167_p2 }
   0x6   : > { %p199_p4 = scmp.lt.s32.totalorder (!%p168_p3), %s418_s12, 1 }
   0x7   : > { %171 = sbr.rel (%p168_p3) target bundleno = 154 (0x9a), region = 32 }
   0xc   : > { %v378_v0 = vld [vmem:[%s488_s1 + $0x8] sm:$0xff]  ;;  %v377_v1 = vld [vmem:[%s488_s1] sm:$0xff]  ;;  %s496_s12 = smov (!%p199_p4, %s418_s12), 1  ;;  %vm240_vm0 = vcmask 261120  }
   0xd   : > { %250 = vmatpush.bf16.msra.mxu0 %v378_v0  ;;  %s364_s20 = sshll.u32 %s496_s12, 3  ;;  %v403_v4 = vld [vmem:[%s489_s2] ss:$0 sm:$0xff] }
   0xe   : > { %s202_s23 = scalar_lea.vmem %s487_s0, %s364_s20  ;;  %s216_s28 = scalar_lea.vmem %s490_s3, %s364_s20 }
   0xf   : > { %v218_v2 = vld [vmem:[%s202_s23] sm:$0xff] }
  0x10   : > { %v219_v3 = vpack.c.bf16 %v218_v2, %v218_v2 }
  0x11   : > { %251 = vmatpush.bf16.msra.mxu0 %v377_v1 }
  0x14   : > { %374 = vmatmul.msk.bf16.vlgmr.msra.gmra.mxu0 %vm240_vm0, %v219_v3 }
  0x91   : > { %v253_v5 = vpop.f32.mrf.mxu0 }
  0x92   : > { %v254_v6 = vadd.f32 %v403_v4, %v253_v5 }
  0x94   : > { %257 = vst [vmem:[%s216_s28] sm:$0xff] %v254_v6 }
  0x99   : > { %v255_v7 = vpop.f32.mrf.mxu0 }
  0x9a PF: > { %s13_s14 = sadd.s32 1, %s426_s14   ;;  %s491_s12 = smov %s422_s13 }
  0x9b   : > { %p10_p5 = scmp.ge.s32.totalorder %s13_s14, 4   ;;  %s492_s13 = smov %s494_s15 }
  0x9d   :  { %12 = sbr.rel (!%p10_p5) target bundleno = 2 (0x2), region = 68 }

// kernel: transformer_fwd.5
= control target key start
LH: loop header
LB: loop body
LE: loop exit
PB: predicated region body
PF: predicated region fallthrough
CT: control target
= control target key end

     0   :  { %s1766_s18 = smov 0   ;;  %s1994_s0 = inlined_call_operand.vmem [shape: f32[2,8,32], index: 0, kind: input, shape index: {}]   ;;  %s1995_s1 = inlined_call_operand.vmem [shape: f32[2,1,8], index: 1, kind: input, shape index: {}]   ;;  %s1996_s2 = inlined_call_operand.vmem [shape: bf16[4,32,8], index: 2, kind: input, shape index: {}]   ;;  %s1997_s3 = inlined_call_operand.vmem [shape: bf16[4,32,8], index: 3, kind: input, shape index: {}]   ;;  %s1998_s4 = inlined_call_operand.vmem [shape: bf16[4,32,8], index: 4, kind: input, shape index: {}]   ;;  %s1999_s5 = inlined_call_operand.vmem [shape: bf16[4,8,32], index: 5, kind: input, shape index: {}]   ;;  %s2000_s6 = inlined_call_operand.vmem [shape: f32[1,32], index: 6, kind: input, shape index: {}]   ;;  %s2001_s7 = inlined_call_operand.vmem [shape: f32[1,32], index: 7, kind: input, shape index: {}]   ;;  %s2002_s8 = inlined_call_operand.vmem [shape: f32[1,32], index: 8, kind: input, shape index: {}]   ;;  %s2003_s9 = inlined_call_operand.vmem [shape: bf16[32,128], index: 9, kind: input, shape index: {}]   ;;  %s2004_s10 = inlined_call_operand.vmem [shape: f32[1,128], index: 10, kind: input, shape index: {}]   ;;  %s2005_s11 = inlined_call_operand.vmem [shape: bf16[128,32], index: 11, kind: input, shape index: {}]   ;;  %s2006_s12 = inlined_call_operand.vmem [shape: f32[1,32], index: 12, kind: input, shape index: {}]   ;;  %s2007_s13 = inlined_call_operand.vmem [shape: f32[1,32], index: 13, kind: input, shape index: {}]   ;;  %s2008_s14 = inlined_call_operand.vmem [shape: f32[1,32], index: 14, kind: input, shape index: {}]   ;;  %s2009_s15 = inlined_call_operand.vmem [shape: f32[2,8,32], index: 15, kind: output, shape index: {}]  }
   0x1 LB: > { %s1431_s19 = sadd.s32 4294967295, %s1681_s18   ;;  %p1435_p0 = scmp.ge.s32.totalorder %s1681_s18, 1  ;;  %s1681_s18 = sphi %s1766_s18, %s25_s18  }
   0x2   : > { %p444_p1 = scmp.lt.s32.totalorder %s1681_s18, 3 }
   0x4   : > { %p445_p2 = pnand %p1435_p0, %p444_p1 }
   0x5   : > { %p493_p3 = scmp.lt.s32.totalorder (!%p445_p2), %s1431_s19, 1 }
   0x6   : > { %448 = sbr.rel (%p445_p2) target bundleno = 1665 (0x681), region = 80 }
   0xb   : > { %v1602_v0 = vld [vmem:[%s1996_s2 + $0x8] sm:$0xff]  ;;  %v1604_v1 = vld [vmem:[%s1996_s2 + $0x18] sm:$0xff]  ;;  %v1601_v4 = vld [vmem:[%s1996_s2] sm:$0xff]  ;;  %s2011_s19 = smov (!%p493_p3, %s1431_s19), 1  ;;  %vm578_vm0 = vcmask 261120   ;;  %vm882_vm1 = vcmask 64512  }
   0xc   : > { %v1608_v2 = vld [vmem:[%s1996_s2 + $0x38] sm:$0xff]  ;;  %588 = vmatpush.bf16.msra.mxu0 %v1602_v0  ;;  %613 = vmatpush.bf16.msra.mxu2 %v1604_v1  ;;  %v1603_v5 = vld [vmem:[%s1996_s2 + $0x10] sm:$0xff]  ;;  %s1436_s23 = sshll.u32 %s2011_s19, 3  ;;  %v1606_v8 = vld [vmem:[%s1996_s2 + $0x28] sm:$0xff]  ;;  %vm1010_vm2 = vcmask 1043456   ;;  %s499_s25 = scalar_lea.vmem %s1995_s1, %s2011_s19 }
   0xd   : > { %v1612_v3 = vld [vmem:[%s1997_s3 + $0x18] sm:$0xff]  ;;  %663 = vmatpush.bf16.msra.mxu3 %v1608_v2  ;;  %v1607_v6 = vld [vmem:[%s1996_s2 + $0x30] sm:$0xff]  ;;  %v1610_v9 = vld [vmem:[%s1997_s3 + $0x8] sm:$0xff]  ;;  %s496_s30 = scalar_lea.vmem %s1994_s0, %s1436_s23  ;;  %s503_s21 = scalar_lea.vmem %s2009_s15, %s1436_s23 }
   0xe   : > { %717 = vmatpush.bf16.msra.mxu1 %v1612_v3  ;;  %v1611_v7 = vld [vmem:[%s1997_s3 + $0x10] sm:$0xff]  ;;  %v1616_v10 = vld [vmem:[%s1997_s3 + $0x38] sm:$0xff]  ;;  %v1815_v11 = vld [vmem:[%s496_s30] sm:$0xff] }
   0xf   : > { %v565_v12 = vpack.c.bf16 %v1815_v11, %v1815_v11  ;;  %v1605_v13 = vld [vmem:[%s1996_s2 + $0x20] sm:$0xff]  ;;  %v1614_v15 = vld [vmem:[%s1997_s3 + $0x28] sm:$0xff]  ;;  %v1620_v16 = vld [vmem:[%s1998_s4 + $0x18] sm:$0xff] }
  0x10   : > { %589 = vmatpush.bf16.msra.mxu0 %v1601_v4  ;;  %614 = vmatpush.bf16.msra.mxu2 %v1603_v5  ;;  %v1609_v14 = vld [vmem:[%s1997_s3] sm:$0xff]  ;;  %v1615_v17 = vld [vmem:[%s1997_s3 + $0x30] sm:$0xff]  ;;  %v1618_v20 = vld [vmem:[%s1998_s4 + $0x8] sm:$0xff] }
  0x11   : > { %664 = vmatpush.bf16.msra.mxu3 %v1607_v6  ;;  %v1619_v18 = vld [vmem:[%s1998_s4 + $0x10] sm:$0xff]  ;;  %v1613_v19 = vld [vmem:[%s1997_s3 + $0x20] sm:$0xff]  ;;  %v1624_v22 = vld [vmem:[%s1998_s4 + $0x38] sm:$0xff] }
  0x12   : > { %718 = vmatpush.bf16.msra.mxu1 %v1611_v7  ;;  %v1617_v21 = vld [vmem:[%s1998_s4] sm:$0xff]  ;;  %v1623_v23 = vld [vmem:[%s1998_s4 + $0x30] sm:$0xff]  ;;  %v1622_v24 = vld [vmem:[%s1998_s4 + $0x28] sm:$0xff] }
  0x13   : > { %1446 = vmatmul.msk.bf16.vlgmr.msra.gmra.mxu0 %vm578_vm0, %v565_v12  ;;  %1455 = vmatmul.msk.bf16.vlgmr.msra.gmra.mxu2 %vm578_vm0, %v565_v12  ;;  %v1621_v25 = vld [vmem:[%s1998_s4 + $0x20] sm:$0xff] }
  0x14   : > { %638 = vmatpush.bf16.msrb.mxu2 %v1606_v8  ;;  %692 = vmatpush.bf16.msrb.mxu0 %v1610_v9  ;;  %v506_v6 = vld [vmem:[%s499_s25] sm:$0x1]  ;;  %v1683_v8 = vmov 0  }
  0x15   : > { %1473 = vmatmul.msk.bf16.vlgmr.msra.gmra.mxu3 %vm578_vm0, %v565_v12  ;;  %1491 = vmatmul.msk.bf16.vlgmr.msra.gmra.mxu1 %vm578_vm0, %v565_v12  ;;  %vm507_vm3 = vcmp.gt.f32.partialorder %v506_v6, 0.5 }
  0x16   : > { %767 = vmatpush.bf16.msrb.mxu3 %v1616_v10  ;;  %821 = vmatpush.bf16.msrb.mxu1 %v1620_v16  ;;  %v508_v9 = vsel %vm507_vm3, 1, %v1683_v8 }
  0x17   : > { %v509_v10 = vperm.slane %v508_v9, 0  ;;  %v563_v9 = vld [vmem:[%s1999_s5 + $0xc] sm:$0xf] }
  0x18   : > { %639 = vmatpush.bf16.msrb.mxu2 %v1605_v13  ;;  %693 = vmatpush.bf16.msrb.mxu0 %v1609_v14  ;;  %v1684_v13 = vmov -1e+20  }
  0x19   : > { %vm510_vm4 = vcmp.eq.s32.totalorder %v509_v10, 1  ;;  %v1149_v10 = vsel %vm1010_vm2, %v563_v9, 0 }
  0x1a   : > { %768 = vmatpush.bf16.msrb.mxu3 %v1615_v17  ;;  %822 = vmatpush.bf16.msrb.mxu1 %v1619_v18  ;;  %v511_v14 = vsel %vm510_vm4, 0.0, %v1684_v13 }
  0x1c   : > { %742 = vmatpush.bf16.msra.mxu2 %v1614_v15  ;;  %796 = vmatpush.bf16.msra.mxu0 %v1618_v20 }
  0x1e   : > { %871 = vmatpush.bf16.msra.mxu3 %v1624_v22 }
  0x20   : > { %743 = vmatpush.bf16.msra.mxu2 %v1613_v19  ;;  %797 = vmatpush.bf16.msra.mxu0 %v1617_v21 }
  0x22   : > { %872 = vmatpush.bf16.msra.mxu3 %v1623_v23 }
  0x23   : > { %1464 = vmatmul.msk.bf16.vlgmr.msrb.gmra.mxu2 %vm578_vm0, %v565_v12  ;;  %1482 = vmatmul.msk.bf16.vlgmr.msrb.gmra.mxu0 %vm578_vm0, %v565_v12 }
  0x24   : > { %846 = vmatpush.bf16.msrb.mxu2 %v1622_v24 }
  0x25   : > { %1509 = vmatmul.msk.bf16.vlgmr.msrb.gmra.mxu3 %vm578_vm0, %v565_v12  ;;  %1527 = vmatmul.msk.bf16.vlgmr.msrb.gmra.mxu1 %vm578_vm0, %v565_v12 }
  0x28   : > { %847 = vmatpush.bf16.msrb.mxu2 %v1621_v25 }
  0x33   : > { %1500 = vmatmul.msk.bf16.vlgmr.msra.gmra.mxu2 %vm578_vm0, %v565_v12  ;;  %1518 = vmatmul.msk.bf16.vlgmr.msra.gmra.mxu0 %vm578_vm0, %v565_v12 }
  0x35   : > { %1545 = vmatmul.msk.bf16.vlgmr.msra.gmra.mxu3 %vm578_vm0, %v565_v12 }
  0x43   : > { %1536 = vmatmul.msk.bf16.vlgmr.msrb.gmra.mxu2 %vm578_vm0, %v565_v12 }
  0x90   : > { %v591_v26 = vpop.f32.mrf.mxu0 }
  0x91   : > { %v670_v44 = vpack.c.bf16 %v591_v26, %v591_v26 }
  0x92   : > { %v720_v27 = vpop.f32.mrf.mxu1 }
  0x93   : > { %v775_v28 = vpack.c.bf16 %v720_v27, %v720_v27 }
  0x95   : > { %v906_v29 = vsel %vm882_vm1, %v775_v28, 0 }
  0x96   : > { %915 = vmatpush.bf16.xpose.msra.mxu1 %v906_v29  ;;  %v616_v30 = vpop.f32.mrf.mxu2 }
  0x97   : > { %v671_v34 = vpack.c.bf16 %v616_v30, %v616_v30 }
  0x98   : > { %v666_v31 = vpop.f32.mrf.mxu3  ;;  %v593_v32 = vpop.f32.mrf.mxu0 }
  0x99   : > { %v673_v50 = vpack.c.bf16 %v666_v31, %v666_v31 }
  0x9a   : > { %v722_v33 = vpop.f32.mrf.mxu1 }
  0x9d   : > { %1547 = vmatmul.msk.bf16.vlgmr.msra.gmra.mxu1 %vm882_vm1, %v671_v34 }
  0x9e   : > { %v618_v35 = vpop.f32.mrf.mxu2 }
  0xa0   : > { %v668_v36 = vpop.f32.mrf.mxu3  ;;  %v695_v37 = vpop.f32.mrf.mxu0 }
  0xa1   : > { %v774_v38 = vpack.c.bf16 %v695_v37, %v695_v37 }
  0xa2   : > { %v824_v39 = vpop.f32.mrf.mxu1 }
  0xa3   : > { %v879_v40 = vpack.c.bf16 %v824_v39, %v824_v39  ;;  %v887_v41 = vsel %vm882_vm1, %v774_v38, 0 }
  0xa4   : > { %896 = vmatpush.bf16.xpose.msrb.mxu0 %v887_v41 }
  0xa5   : > { %v1031_v42 = vsel %vm1010_vm2, %v879_v40, 0 }
  0xa6   : > { %1040 = vmatpush.bf16.msrb.mxu1 %v1031_v42  ;;  %v641_v43 = vpop.f32.mrf.mxu2 }
  0xa7   : > { %v672_v57 = vpack.c.bf16 %v641_v43, %v641_v43 }
  0xa8   : > { %v770_v45 = vpop.f32.mrf.mxu3  ;;  %v697_v47 = vpop.f32.mrf.mxu0 }
  0xa9   : > { %v777_v46 = vpack.c.bf16 %v770_v45, %v770_v45 }
  0xaa   : > { %v826_v48 = vpop.f32.mrf.mxu1 }
  0xab   : > { %v944_v49 = vsel %vm882_vm1, %v777_v46, 0  ;;  %1546 = vmatmul.msk.bf16.vlgmr.msrb.gmra.mxu0 %vm882_vm1, %v670_v44 }
  0xac   : > { %953 = vmatpush.bf16.xpose.msrb.mxu3 %v944_v49 }
  0xae   : > { %v643_v51 = vpop.f32.mrf.mxu2 }
  0xb0   : > { %v772_v52 = vpop.f32.mrf.mxu3  ;;  %v799_v58 = vpop.f32.mrf.mxu0 }
  0xb1   : > { %v878_v59 = vpack.c.bf16 %v799_v58, %v799_v58 }
  0xb3   : > { %1549 = vmatmul.msk.bf16.vlgmr.msrb.gmra.mxu3 %vm882_vm1, %v673_v50  ;;  %v1012_v60 = vsel %vm1010_vm2, %v878_v59, 0 }
  0xb4   : > { %1021 = vmatpush.bf16.msra.mxu0 %v1012_v60 }
  0xb6   : > { %v745_v53 = vpop.f32.mrf.mxu2 }
  0xb7   : > { %v776_v54 = vpack.c.bf16 %v745_v53, %v745_v53 }
  0xb8   : > { %v801_v61 = vpop.f32.mrf.mxu0  ;;  %v874_v62 = vpop.f32.mrf.mxu3 }
  0xb9   : > { %v925_v55 = vsel %vm882_vm1, %v776_v54, 0  ;;  %v881_v63 = vpack.c.bf16 %v874_v62, %v874_v62 }
  0xba   : > { %934 = vmatpush.bf16.xpose.msra.mxu2 %v925_v55 }
  0xbb   : > { %v1069_v0 = vsel %vm1010_vm2, %v881_v63, 0 }
  0xbc   : > { %1078 = vmatpush.bf16.msra.mxu3 %v1069_v0 }
  0xbe   : > { %v747_v56 = vpop.f32.mrf.mxu2 }
  0xc0   : > { %v876_v1 = vpop.f32.mrf.mxu3  ;;  %1158 = vmatpush.bf16.msrb.mxu3 %v1149_v10 }
  0xc1   : > { %1548 = vmatmul.msk.bf16.vlgmr.msra.gmra.mxu2 %vm882_vm1, %v672_v57  ;;  %v560_v1 = vld [vmem:[%s1999_s5] sm:$0xf] }
  0xc6   : > { %v849_v2 = vpop.f32.mrf.mxu2 }
  0xc7   : > { %v880_v3 = vpack.c.bf16 %v849_v2, %v849_v2  ;;  %v1092_v2 = vsel %vm1010_vm2, %v560_v1, 0 }
  0xc8   : > { %1101 = vmatpush.bf16.msrb.mxu0 %v1092_v2  ;;  %v1629_v2 = vld [vmem:[%s2005_s11 + $0x10] sm:$0xff] }
  0xc9   : > { %v1050_v4 = vsel %vm1010_vm2, %v880_v3, 0  ;;  %v561_v3 = vld [vmem:[%s1999_s5 + $0x4] sm:$0xf] }
  0xca   : > { %1059 = vmatpush.bf16.msrb.mxu2 %v1050_v4  ;;  %v1111_v4 = vsel %vm1010_vm2, %v561_v3, 0 }
  0xcb   : > { %1120 = vmatpush.bf16.msra.mxu1 %v1111_v4 }
  0xce   : > { %v851_v5 = vpop.f32.mrf.mxu2 }
 0x11a   : > { %v917_v7 = vpop.f32.mrf.mxu1 }
 0x11b   : > { %v918_v18 = vadd.f32 %v917_v7, %v511_v14  ;;  %v562_v7 = vld [vmem:[%s1999_s5 + $0x8] sm:$0xf] }
 0x11c   : > { %v1130_v8 = vsel %vm1010_vm2, %v562_v7, 0  ;;  %v1648_v7 = vld [vmem:[%s2002_s8] ss:$0 sm:$0xff] }
 0x11d   : > { %v962_v20 = vsel %vm882_vm1, %v918_v18, -inf  ;;  %1139 = vmatpush.bf16.msra.mxu2 %v1130_v8 }
 0x122   : > { %v919_v12 = vpop.f32.mrf.mxu1 }
 0x128   : > { %v898_v15 = vpop.f32.mrf.mxu0 }
 0x129   : > { %v899_v16 = vadd.f32 %v898_v15, %v511_v14 }
 0x12b   : > { %v959_v17 = vsel %vm882_vm1, %v899_v16, -inf }
 0x12c   : > { %960 = vmax.xlane.f32.xlu1 %v959_v17 }
 0x130   : > { %v900_v19 = vpop.f32.mrf.mxu0 }
 0x134   : > { %963 = vmax.xlane.f32.xlu1 %v962_v20 }
 0x136   : > { %v955_v21 = vpop.f32.mrf.mxu3 }
 0x137   : > { %v956_v26 = vadd.f32 %v955_v21, %v511_v14 }
 0x139   : > { %v968_v28 = vsel %vm882_vm1, %v956_v26, -inf }
 0x13e   : > { %v957_v22 = vpop.f32.mrf.mxu3 }
 0x144   : > { %v936_v23 = vpop.f32.mrf.mxu2 }
 0x145   : > { %v937_v24 = vadd.f32 %v936_v23, %v511_v14 }
 0x147   : > { %v965_v25 = vsel %vm882_vm1, %v937_v24, -inf }
 0x148   : > { %966 = vmax.xlane.f32.xlu0 %v965_v25 }
 0x14c   : > { %v938_v27 = vpop.f32.mrf.mxu2 }
 0x150   : > { %969 = vmax.xlane.f32.xlu0 %v968_v28 }
 0x19f   : > { %v961_v29 = vpop.xlane.xlu1 %960 }
 0x1a0   : > { %v971_v30 = vsub.f32 %v899_v16, %v961_v29 }
 0x1a2   : > { %v975_v31 = vmul.f32 1.442695, %v971_v30 }
 0x1a4   : > { %1653 = vpow2.f32 %v975_v31 }
 0x1a7   : > { %v964_v32 = vpop.xlane.xlu1 %963 }
 0x1a8   : > { %v972_v33 = vsub.f32 %v918_v18, %v964_v32 }
 0x1aa   : > { %v1654_v34 = vpop.eup %1653  ;;  %v977_v35 = vmul.f32 1.442695, %v972_v33 }
 0x1ab   : > { %v983_v36 = vsel %vm882_vm1, %v1654_v34, 0.0 }
 0x1ac   : > { %1655 = vpow2.f32 %v977_v35  ;;  %984 = vadd.xlane.f32.xlu0 %v983_v36 }
 0x1b2   : > { %v1656_v37 = vpop.eup %1655 }
 0x1b3   : > { %v986_v38 = vsel %vm882_vm1, %v1656_v37, 0.0 }
 0x1b4   : > { %987 = vadd.xlane.f32.xlu1 %v986_v38 }
 0x1bb   : > { %v967_v39 = vpop.xlane.xlu0 %966 }
 0x1bc   : > { %v973_v40 = vsub.f32 %v937_v24, %v967_v39 }
 0x1be   : > { %v979_v41 = vmul.f32 1.442695, %v973_v40 }
 0x1c0   : > { %1657 = vpow2.f32 %v979_v41  ;;  %v1685_v41 = vmov 32.0  }
 0x1c3   : > { %v970_v42 = vpop.xlane.xlu0 %969 }
 0x1c4   : > { %v974_v43 = vsub.f32 %v956_v26, %v970_v42 }
 0x1c6   : > { %v1658_v44 = vpop.eup %1657  ;;  %v981_v45 = vmul.f32 1.442695, %v974_v43 }
 0x1c7   : > { %v989_v46 = vsel %vm882_vm1, %v1658_v44, 0.0 }
 0x1c8   : > { %1659 = vpow2.f32 %v981_v45  ;;  %990 = vadd.xlane.f32.xlu2 %v989_v46 }
 0x1ce   : > { %v1660_v47 = vpop.eup %1659 }
 0x1cf   : > { %v992_v48 = vsel %vm882_vm1, %v1660_v47, 0.0 }
 0x1d0   : > { %993 = vadd.xlane.f32.xlu2 %v992_v48 }
 0x21f   : > { %v985_v49 = vpop.xlane.xlu0 %984 }
 0x220   : > { %1661 = vrcp.f32 %v985_v49 }
 0x226   : > { %v1662_v50 = vpop.eup %1661 }
 0x227   : > { %v999_v51 = vmul.f32 %v1662_v50, %v1654_v34  ;;  %v988_v52 = vpop.xlane.xlu1 %987  ;;  %v1646_v34 = vld [vmem:[%s2000_s6] ss:$0 sm:$0xff] }
 0x228   : > { %1663 = vrcp.f32 %v988_v52  ;;  %v1626_v52 = vld [vmem:[%s2003_s9 + $0x8] sm:$0xff] }
 0x229   : > { %v1003_v53 = vpack.c.bf16 %v999_v51, %v999_v51 }
 0x22b   : > { %1550 = vmatmul.msk.bf16.vlgmr.msra.gmra.mxu0 %vm882_vm1, %v1003_v53  ;;  %v1625_v53 = vld [vmem:[%s2003_s9] sm:$0xff] }
 0x22c   : > { %1262 = vmatpush.bf16.msra.mxu0 %v1626_v52 }
 0x22e   : > { %v1664_v54 = vpop.eup %1663 }
 0x22f   : > { %v1000_v55 = vmul.f32 %v1664_v54, %v1656_v37  ;;  %v1634_v54 = vld [vmem:[%s2005_s11 + $0x38] sm:$0xff] }
 0x230   : > { %1263 = vmatpush.bf16.msra.mxu0 %v1625_v53 }
 0x231   : > { %v1004_v56 = vpack.c.bf16 %v1000_v55, %v1000_v55 }
 0x233   : > { %1551 = vmatmul.msk.bf16.vlgmr.msrb.gmra.mxu1 %vm882_vm1, %v1004_v56 }
 0x234   : > { %1322 = vmatpush.bf16.msrb.mxu1 %v1634_v54 }
 0x23b   : > { %v991_v57 = vpop.xlane.xlu2 %990 }
 0x23c   : > { %1665 = vrcp.f32 %v991_v57  ;;  %v1633_v57 = vld [vmem:[%s2005_s11 + $0x30] sm:$0xff] }
 0x23d   : > { %1323 = vmatpush.bf16.msrb.mxu1 %v1633_v57 }
 0x242   : > { %v1666_v58 = vpop.eup %1665 }
 0x243   : > { %v1001_v59 = vmul.f32 %v1666_v58, %v1658_v44  ;;  %v994_v60 = vpop.xlane.xlu2 %993 }
 0x244   : > { %1667 = vrcp.f32 %v994_v60  ;;  %v1631_v60 = vld [vmem:[%s2005_s11 + $0x20] sm:$0xff] }
 0x245   : > { %v1005_v61 = vpack.c.bf16 %v1001_v59, %v1001_v59  ;;  %1669 = vrcp.f32 %v1685_v41  ;;  %v1632_v59 = vld [vmem:[%s2005_s11 + $0x28] sm:$0xff]  ;;  %v1651_v41 = vld [vmem:[%s2007_s13] ss:$0 sm:$0xff] }
 0x246   : > { %1324 = vmatpush.bf16.msrb.mxu1 %v1632_v59 }
 0x247   : > { %1552 = vmatmul.msk.bf16.vlgmr.msrb.gmra.mxu2 %vm882_vm1, %v1005_v61 }
 0x24a   : > { %v1668_v62 = vpop.eup %1667  ;;  %1325 = vmatpush.bf16.msrb.mxu1 %v1631_v60 }
 0x24b   : > { %v1002_v63 = vmul.f32 %v1668_v62, %v1660_v47  ;;  %v1670_v42 = vpop.eup %1669 }
 0x24c   : > { %v1182_v43 = vmul.f32 32.0, %v1670_v42  ;;  %vm1186_vm5 = vweird.f32 %v1670_v42 }
 0x24d   : > { %v1006_v0 = vpack.c.bf16 %v1002_v63, %v1002_v63  ;;  %v1630_v63 = vld [vmem:[%s2005_s11 + $0x18] sm:$0xff] }
 0x24e   : > { %v1183_v44 = vsub.f32 1.0, %v1182_v43  ;;  %1326 = vmatpush.bf16.msrb.mxu1 %v1630_v63  ;;  %v1652_v43 = vld [vmem:[%s2008_s14] ss:$0 sm:$0xff] }
 0x24f   : > { %1553 = vmatmul.msk.bf16.vlgmr.msra.gmra.mxu3 %vm882_vm1, %v1006_v0 }
 0x250   : > { %v1184_v45 = vmul.f32 %v1670_v42, %v1183_v44 }
 0x252   : > { %v1185_v46 = vadd.f32 %v1670_v42, %v1184_v45  ;;  %1327 = vmatpush.bf16.msrb.mxu1 %v1629_v2 }
 0x254   : > { %v1927_v47 = vsel %vm1186_vm5, %v1670_v42, %v1185_v46 }
 0x2a8   : > { %v1023_v5 = vpop.f32.mrf.mxu0 }
 0x2a9   : > { %v1084_v6 = vpack.c.bf16 %v1023_v5, %v1023_v5  ;;  %v1647_v5 = vld [vmem:[%s2001_s7] ss:$0 sm:$0xff] }
 0x2ab   : > { %1554 = vmatmul.msk.bf16.vlgmr.msrb.gmra.mxu0 %vm882_vm1, %v1084_v6 }
 0x2b0   : > { %v1025_v12 = vpop.f32.mrf.mxu0  ;;  %v1042_v13 = vpop.f32.mrf.mxu1 }
 0x2b1   : > { %v1085_v14 = vpack.c.bf16 %v1042_v13, %v1042_v13  ;;  %v1628_v13 = vld [vmem:[%s2005_s11 + $0x8] sm:$0xff] }
 0x2b2   : > { %1328 = vmatpush.bf16.msrb.mxu1 %v1628_v13 }
 0x2b3   : > { %1555 = vmatmul.msk.bf16.vlgmr.msra.gmra.mxu1 %vm882_vm1, %v1085_v14  ;;  %v1627_v14 = vld [vmem:[%s2005_s11] sm:$0xff] }
 0x2b6   : > { %1329 = vmatpush.bf16.msrb.mxu1 %v1627_v14 }
 0x2b8   : > { %v1044_v15 = vpop.f32.mrf.mxu1 }
 0x2b9   : > { %v1649_v15 = vld [vmem:[%s2004_s10] ss:$0 sm:$0xff] }
 0x2ca   : > { %v1061_v16 = vpop.f32.mrf.mxu2 }
 0x2cb   : > { %v1086_v17 = vpack.c.bf16 %v1061_v16, %v1061_v16 }
 0x2cd   : > { %1556 = vmatmul.msk.bf16.vlgmr.msra.gmra.mxu2 %vm882_vm1, %v1086_v17 }
 0x2d2   : > { %v1063_v18 = vpop.f32.mrf.mxu2  ;;  %v1080_v19 = vpop.f32.mrf.mxu3 }
 0x2d3   : > { %v1087_v20 = vpack.c.bf16 %v1080_v19, %v1080_v19 }
 0x2d5   : > { %1557 = vmatmul.msk.bf16.vlgmr.msrb.gmra.mxu3 %vm882_vm1, %v1087_v20 }
 0x2da   : > { %v1082_v21 = vpop.f32.mrf.mxu3 }
 0x2db   : > { %v1650_v21 = vld [vmem:[%s2006_s12] ss:$0 sm:$0xff] }
 0x328   : > { %v1103_v22 = vpop.f32.mrf.mxu0 }
 0x329   : > { %v1164_v28 = vsel %vm578_vm0, %v1103_v22, 0.0 }
 0x330   : > { %v1105_v23 = vpop.f32.mrf.mxu0  ;;  %v1122_v24 = vpop.f32.mrf.mxu1 }
 0x331   : > { %v1165_v27 = vsel %vm578_vm0, %v1122_v24, 0.0 }
 0x332   : > { %v1166_v30 = vadd.f32 %v1165_v27, %v1164_v28 }
 0x338   : > { %v1124_v25 = vpop.f32.mrf.mxu1 }
 0x350   : > { %v1141_v26 = vpop.f32.mrf.mxu2 }
 0x351   : > { %v1167_v29 = vsel %vm578_vm0, %v1141_v26, 0.0 }
 0x352   : > { %v1168_v31 = vadd.f32 %v1167_v29, %v1166_v30 }
 0x358   : > { %v1143_v32 = vpop.f32.mrf.mxu2  ;;  %v1160_v33 = vpop.f32.mrf.mxu3 }
 0x359   : > { %v1169_v35 = vsel %vm578_vm0, %v1160_v33, 0.0 }
 0x35a   : > { %v1170_v36 = vadd.f32 %v1169_v35, %v1168_v31 }
 0x35c   : > { %v1174_v37 = vadd.f32 %v1646_v34, %v1170_v36 }
 0x35e   : > { %v1175_v38 = vadd.f32 %v1174_v37, %v1815_v11 }
 0x360   : > { %v1162_v39 = vpop.f32.mrf.mxu3  ;;  %v1178_v40 = vsel %vm578_vm0, %v1175_v38, 0.0 }
 0x361   : > { %1179 = vadd.xlane.f32.xlu2 %v1178_v40 }
 0x3d4   : > { %v1180_v48 = vpop.xlane.xlu2 %1179 }
 0x3d5   : > { %v1188_v49 = vmul.f32 %v1927_v47, %v1180_v48 }
 0x3d7   : > { %v1189_v50 = vsub.f32 %v1175_v38, %v1188_v49 }
 0x3d9   : > { %v1190_v51 = vmul.f32 %v1189_v50, %v1189_v50 }
 0x3db   : > { %v1191_v11 = vsel %vm578_vm0, %v1190_v51, 0.0 }
 0x3dc   : > { %1192 = vadd.xlane.f32.xlu0 %v1191_v11 }
 0x44f   : > { %v1193_v55 = vpop.xlane.xlu0 %1192 }
 0x450   : > { %v1194_v56 = vmul.f32 %v1193_v55, %v1927_v47 }
 0x452   : > { %v1195_v58 = vadd.f32 1e-05, %v1194_v56 }
 0x454   : > { %1671 = vrsqrt.f32 %v1195_v58  ;;  %vm1202_vm7 = vweird.f32 %v1195_v58 }
 0x45a   : > { %v1672_v61 = vpop.eup %1671 }
 0x45b   : > { %v1197_v62 = vmul.f32 %v1672_v61, %v1195_v58  ;;  %vm1203_vm6 = vweird.f32 %v1672_v61 }
 0x45c   : > { %vm1204_vm8 = vmor %vm1202_vm7, %vm1203_vm6 }
 0x45d   : > { %v1198_v0 = vmul.f32 %v1672_v61, %v1197_v62 }
 0x45f   : > { %v1199_v1 = vmul.f32 0.5, %v1198_v0 }
 0x461   : > { %v1200_v3 = vsub.f32 1.5, %v1199_v1 }
 0x463   : > { %v1201_v4 = vmul.f32 %v1672_v61, %v1200_v3 }
 0x465   : > { %v1205_v6 = vsel %vm1204_vm8, %v1672_v61, %v1201_v4 }
 0x466   : > { %v1206_v8 = vmul.f32 %v1205_v6, %v1189_v50 }
 0x468   : > { %v1210_v9 = vmul.f32 %v1647_v5, %v1206_v8 }
 0x46a   : > { %v1214_v10 = vadd.f32 %v1648_v7, %v1210_v9 }
 0x46c   : > { %v1237_v12 = vpack.c.bf16 %v1214_v10, %v1214_v10 }
 0x46e   : > { %1566 = vmatmul.msk.bf16.vlgmr.msra.gmra.mxu0 %vm578_vm0, %v1237_v12 }
 0x4eb   : > { %v1265_v16 = vpop.f32.mrf.mxu0 }
 0x4ec   : > { %v1266_v17 = vadd.f32 %v1649_v15, %v1265_v16 }
 0x4ee   : > { %v1269_v18 = vmax.f32 %v1266_v17, 0.0 }
 0x4f0   : > { %v1270_v19 = vpack.c.bf16 %v1269_v18, %v1269_v18 }
 0x4f2   : > { %1330 = vmatmul.bf16.vlgmr.msrb.gmra.mxu1 %v1270_v19 }
 0x4f3   : > { %v1267_v20 = vpop.f32.mrf.mxu0 }
 0x56f   : > { %v1331_v22 = vpop.f32.mrf.mxu1 }
 0x570   : > { %v1332_v23 = vadd.f32 %v1650_v21, %v1331_v22 }
 0x572   : > { %v1335_v24 = vadd.f32 %v1332_v23, %v1214_v10 }
 0x574   : > { %v1338_v25 = vsel %vm578_vm0, %v1335_v24, 0.0 }
 0x575   : > { %1339 = vadd.xlane.f32.xlu1 %v1338_v25 }
 0x577   : > { %v1333_v26 = vpop.f32.mrf.mxu1 }
 0x5e8   : > { %v1340_v27 = vpop.xlane.xlu1 %1339 }
 0x5e9   : > { %v1341_v28 = vmul.f32 %v1340_v27, %v1927_v47 }
 0x5eb   : > { %v1342_v29 = vsub.f32 %v1335_v24, %v1341_v28 }
 0x5ed   : > { %v1343_v30 = vmul.f32 %v1342_v29, %v1342_v29 }
 0x5ef   : > { %v1344_v31 = vsel %vm578_vm0, %v1343_v30, 0.0 }
 0x5f0   : > { %1345 = vadd.xlane.f32.xlu2 %v1344_v31 }
 0x663   : > { %v1346_v32 = vpop.xlane.xlu2 %1345 }
 0x664   : > { %v1347_v33 = vmul.f32 %v1346_v32, %v1927_v47 }
 0x666   : > { %v1348_v34 = vadd.f32 1e-05, %v1347_v33 }
 0x668   : > { %1673 = vrsqrt.f32 %v1348_v34  ;;  %vm1355_vm10 = vweird.f32 %v1348_v34 }
 0x66e   : > { %v1674_v35 = vpop.eup %1673 }
 0x66f   : > { %v1350_v36 = vmul.f32 %v1674_v35, %v1348_v34  ;;  %vm1356_vm9 = vweird.f32 %v1674_v35 }
 0x670   : > { %vm1357_vm11 = vmor %vm1355_vm10, %vm1356_vm9 }
 0x671   : > { %v1351_v37 = vmul.f32 %v1674_v35, %v1350_v36 }
 0x673   : > { %v1352_v38 = vmul.f32 0.5, %v1351_v37 }
 0x675   : > { %v1353_v39 = vsub.f32 1.5, %v1352_v38 }
 0x677   : > { %v1354_v40 = vmul.f32 %v1674_v35, %v1353_v39 }
 0x679   : > { %v1358_v42 = vsel %vm1357_vm11, %v1674_v35, %v1354_v40 }
 0x67a   : > { %v1359_v44 = vmul.f32 %v1358_v42, %v1342_v29 }
 0x67c   : > { %v1363_v45 = vmul.f32 %v1651_v41, %v1359_v44 }
 0x67e   : > { %v1367_v46 = vadd.f32 %v1652_v43, %v1363_v45 }
 0x680   : > { %1368 = vst.msk [vmem:[%s503_s21] sm:$0xff] %vm578_vm0, %v1367_v46 }
 0x681 PF: > { %s25_s18 = sadd.s32 1, %s1681_s18  }
 0x682   : > { %p22_p4 = scmp.ge.s32.totalorder %s25_s18, 4  }
 0x684   :  { %24 = sbr.rel (!%p22_p4) target bundleno = 1 (0x1), region = 113 }

// kernel: transformer_fwd.7
= control target key start
LH: loop header
LB: loop body
LE: loop exit
PB: predicated region body
PF: predicated region fallthrough
CT: control target
= control target key end

     0   :  { %s3372_s0 = inlined_call_operand.vmem [shape: f32[2,8,32], index: 0, kind: input, shape index: {}]   ;;  %s3373_s1 = inlined_call_operand.vmem [shape: f32[2,8,32], index: 1, kind: input, shape index: {}]   ;;  %s3374_s2 = inlined_call_operand.vmem [shape: f32[2,1,8], index: 2, kind: input, shape index: {}]   ;;  %s3375_s3 = inlined_call_operand.vmem [shape: f32[2,1,8], index: 3, kind: input, shape index: {}]   ;;  %s3376_s4 = inlined_call_operand.vmem [shape: bf16[4,32,8], index: 4, kind: input, shape index: {}]   ;;  %s3377_s5 = inlined_call_operand.vmem [shape: bf16[4,32,8], index: 5, kind: input, shape index: {}]   ;;  %s3378_s6 = inlined_call_operand.vmem [shape: bf16[4,32,8], index: 6, kind: input, shape index: {}]   ;;  %s3379_s7 = inlined_call_operand.vmem [shape: bf16[4,8,32], index: 7, kind: input, shape index: {}]   ;;  %s3380_s8 = inlined_call_operand.vmem [shape: f32[1,32], index: 8, kind: input, shape index: {}]   ;;  %s3381_s9 = inlined_call_operand.vmem [shape: f32[1,32], index: 9, kind: input, shape index: {}]   ;;  %s3382_s10 = inlined_call_operand.vmem [shape: f32[1,32], index: 10, kind: input, shape index: {}]   ;;  %s3383_s11 = inlined_call_operand.vmem [shape: bf16[4,32,8], index: 11, kind: input, shape index: {}]   ;;  %s3384_s12 = inlined_call_operand.vmem [shape: bf16[4,32,8], index: 12, kind: input, shape index: {}]   ;;  %s3385_s13 = inlined_call_operand.vmem [shape: bf16[4,32,8], index: 13, kind: input, shape index: {}]   ;;  %s3386_s14 = inlined_call_operand.vmem [shape: bf16[4,8,32], index: 14, kind: input, shape index: {}]   ;;  %s3387_s15 = inlined_call_operand.vmem [shape: f32[1,32], index: 15, kind: input, shape index: {}]   ;;  %s3388_s16 = inlined_call_operand.vmem [shape: f32[1,32], index: 16, kind: input, shape index: {}]   ;;  %s3389_s17 = inlined_call_operand.vmem [shape: f32[1,32], index: 17, kind: input, shape index: {}]   ;;  %s3390_s18 = inlined_call_operand.vmem [shape: bf16[32,128], index: 18, kind: input, shape index: {}]   ;;  %s3391_s19 = inlined_call_operand.vmem [shape: f32[1,128], index: 19, kind: input, shape index: {}]   ;;  %s3392_s20 = inlined_call_operand.vmem [shape: bf16[128,32], index: 20, kind: input, shape index: {}]   ;;  %s3393_s21 = inlined_call_operand.vmem [shape: f32[1,32], index: 21, kind: input, shape index: {}]   ;;  %s3394_s22 = inlined_call_operand.vmem [shape: f32[1,32], index: 22, kind: input, shape index: {}]   ;;  %s3395_s23 = inlined_call_operand.vmem [shape: f32[1,32], index: 23, kind: input, shape index: {}]   ;;  %s3396_s24 = inlined_call_operand.vmem [shape: f32[2,8,32], index: 24, kind: output, shape index: {}]  }
   0x1   :  { %3402 = sst [smem:[#allocation3_spill]] %s3372_s0 }
   0x2   :  { %3403 = sst [smem:[#allocation4_spill]] %s3373_s1 }
   0x3   :  { %3404 = sst [smem:[#allocation5_spill]] %s3374_s2 }
   0x4   :  { %3405 = sst [smem:[#allocation6_spill]] %s3375_s3 }
   0x5   :  { %3406 = sst [smem:[#allocation7_spill]] %s3376_s4 }
   0x6   :  { %3407 = sst [smem:[#allocation8_spill]] %s3377_s5  ;;  %s2982_s5 = smov 0  }
   0x7   :  { %3408 = sst [smem:[#allocation9_spill]] %s3378_s6 }
   0x8   :  { %3409 = sst [smem:[#allocation10_spill]] %s3379_s7 }
   0x9   :  { %3410 = sst [smem:[#allocation11_spill]] %s3380_s8 }
   0xa   :  { %3411 = sst [smem:[#allocation12_spill]] %s3396_s24 }
   0xb LB: > { %3412 = sst [smem:[#allocation2_spill]] %s2852_s5  ;;  %s2436_s26 = sadd.s32 4294967295, %s2852_s5   ;;  %s2852_s5 = sphi %s2982_s5, %s34_s5  }
   0xc   : > { %p2440_p0 = scmp.ge.s32.totalorder %s2852_s5, 1  ;;  %p686_p1 = scmp.lt.s32.totalorder %s2852_s5, 3 }
   0xe   : > { %p687_p2 = pnand %p2440_p0, %p686_p1 }
   0xf   : > { %s3413_s6 = sld [smem:[#allocation7_spill]] (!%p687_p2)  ;;  %p760_p3 = scmp.lt.s32.totalorder (!%p687_p2), %s2436_s26, 1 }
  0x10   : > { %690 = sbr.rel (%p687_p2) target bundleno = 2770 (0xad2), region = 116  ;;  %s3414_s25 = sld [smem:[#allocation8_spill]] (!%p687_p2) }
  0x11   : > { %s3415_s5 = sld [smem:[#allocation3_spill]] (!%p687_p2) }
  0x12   : > { %s3416_s1 = sld [smem:[#allocation9_spill]] (!%p687_p2) }
  0x13   : > { %s3417_s8 = sld [smem:[#allocation5_spill]] (!%p687_p2) }
  0x14   : > { %s3418_s2 = sld [smem:[#allocation10_spill]] (!%p687_p2) }
  0x15   : > { %v2728_v0 = vld [vmem:[%s3413_s6 + $0x8] sm:$0xff]  ;;  %v2730_v1 = vld [vmem:[%s3413_s6 + $0x18] sm:$0xff]  ;;  %v2727_v4 = vld [vmem:[%s3413_s6] sm:$0xff]  ;;  %s3425_s26 = smov (!%p760_p3, %s2436_s26), 1  ;;  %vm859_vm0 = vcmask 261120   ;;  %vm1163_vm1 = vcmask 64512  }
  0x16   : > { %v2734_v2 = vld [vmem:[%s3413_s6 + $0x38] sm:$0xff]  ;;  %869 = vmatpush.bf16.msra.mxu0 %v2728_v0  ;;  %894 = vmatpush.bf16.msra.mxu2 %v2730_v1  ;;  %v2729_v5 = vld [vmem:[%s3413_s6 + $0x10] sm:$0xff]  ;;  %s3017_s7 = sshll.u32 %s3425_s26, 3  ;;  %v2732_v8 = vld [vmem:[%s3413_s6 + $0x28] sm:$0xff]  ;;  %vm1291_vm2 = vcmask 1043456   ;;  %s3419_s27 = sld [smem:[#allocation11_spill]] }
  0x17   : > { %v2738_v3 = vld [vmem:[%s3414_s25 + $0x18] sm:$0xff]  ;;  %944 = vmatpush.bf16.msra.mxu3 %v2734_v2  ;;  %v2733_v6 = vld [vmem:[%s3413_s6 + $0x30] sm:$0xff]  ;;  %v2736_v9 = vld [vmem:[%s3414_s25 + $0x8] sm:$0xff]  ;;  %s763_s28 = scalar_lea.vmem %s3415_s5, %s3017_s7 }
  0x18   : > { %998 = vmatpush.bf16.msra.mxu1 %v2738_v3  ;;  %v2737_v7 = vld [vmem:[%s3414_s25 + $0x10] sm:$0xff]  ;;  %v2742_v10 = vld [vmem:[%s3414_s25 + $0x38] sm:$0xff]  ;;  %v3032_v11 = vld [vmem:[%s763_s28] sm:$0xff] }
  0x19   : > { %v2731_v12 = vld [vmem:[%s3413_s6 + $0x20] sm:$0xff]  ;;  %v846_v14 = vpack.c.bf16 %v3032_v11, %v3032_v11  ;;  %v2740_v15 = vld [vmem:[%s3414_s25 + $0x28] sm:$0xff]  ;;  %v2746_v16 = vld [vmem:[%s3416_s1 + $0x18] sm:$0xff]  ;;  %s770_s4 = scalar_lea.vmem %s3417_s8, %s3425_s26 }
  0x1a   : > { %870 = vmatpush.bf16.msra.mxu0 %v2727_v4  ;;  %895 = vmatpush.bf16.msra.mxu2 %v2729_v5  ;;  %v2735_v13 = vld [vmem:[%s3414_s25] sm:$0xff]  ;;  %v2741_v17 = vld [vmem:[%s3414_s25 + $0x30] sm:$0xff]  ;;  %v2744_v20 = vld [vmem:[%s3416_s1 + $0x8] sm:$0xff] }
  0x1b   : > { %945 = vmatpush.bf16.msra.mxu3 %v2733_v6  ;;  %v2745_v18 = vld [vmem:[%s3416_s1 + $0x10] sm:$0xff]  ;;  %v2739_v19 = vld [vmem:[%s3414_s25 + $0x20] sm:$0xff]  ;;  %v2750_v22 = vld [vmem:[%s3416_s1 + $0x38] sm:$0xff] }
  0x1c   : > { %999 = vmatpush.bf16.msra.mxu1 %v2737_v7  ;;  %v2743_v21 = vld [vmem:[%s3416_s1] sm:$0xff]  ;;  %v2749_v23 = vld [vmem:[%s3416_s1 + $0x30] sm:$0xff]  ;;  %v2748_v24 = vld [vmem:[%s3416_s1 + $0x28] sm:$0xff] }
  0x1d   : > { %2452 = vmatmul.msk.bf16.vlgmr.msra.gmra.mxu0 %vm859_vm0, %v846_v14  ;;  %2461 = vmatmul.msk.bf16.vlgmr.msra.gmra.mxu2 %vm859_vm0, %v846_v14  ;;  %v2747_v25 = vld [vmem:[%s3416_s1 + $0x20] sm:$0xff] }
  0x1e   : > { %919 = vmatpush.bf16.msrb.mxu2 %v2732_v8  ;;  %973 = vmatpush.bf16.msrb.mxu0 %v2736_v9  ;;  %v781_v5 = vld [vmem:[%s770_s4] sm:$0x1]  ;;  %v786_v8 = vlaneseq  ;;  %v2854_v9 = vmov 0   ;;  %s3420_s4 = sld [smem:[#allocation4_spill]] }
  0x1f   : > { %2479 = vmatmul.msk.bf16.vlgmr.msra.gmra.mxu3 %vm859_vm0, %v846_v14  ;;  %2497 = vmatmul.msk.bf16.vlgmr.msra.gmra.mxu1 %vm859_vm0, %v846_v14  ;;  %vm782_vm3 = vcmp.gt.f32.partialorder %v781_v5, 0.5 }
  0x20   : > { %1048 = vmatpush.bf16.msrb.mxu3 %v2742_v10  ;;  %1102 = vmatpush.bf16.msrb.mxu1 %v2746_v16  ;;  %v783_v10 = vsel %vm782_vm3, 1, %v2854_v9  ;;  %v2855_v16 = vmov -1e+20  }
  0x22   : > { %920 = vmatpush.bf16.msrb.mxu2 %v2731_v12  ;;  %974 = vmatpush.bf16.msrb.mxu0 %v2735_v13  ;;  %v784_v12 = vperm.slane %v783_v10, 0  ;;  %v787_v13 = vshrl.u32 %v786_v8, 7 }
  0x24   : > { %1049 = vmatpush.bf16.msrb.mxu3 %v2741_v17  ;;  %1103 = vmatpush.bf16.msrb.mxu1 %v2745_v18  ;;  %vm785_vm4 = vcmp.eq.s32.totalorder %v784_v12, 1  ;;  %v843_v12 = vld [vmem:[%s3418_s2 + $0x8] sm:$0xf] }
  0x26   : > { %1023 = vmatpush.bf16.msra.mxu2 %v2740_v15  ;;  %1077 = vmatpush.bf16.msra.mxu0 %v2744_v20 }
  0x28   : > { %1152 = vmatpush.bf16.msra.mxu3 %v2750_v22 }
  0x2a   : > { %1024 = vmatpush.bf16.msra.mxu2 %v2739_v19  ;;  %1078 = vmatpush.bf16.msra.mxu0 %v2743_v21 }
  0x2c   : > { %1153 = vmatpush.bf16.msra.mxu3 %v2749_v23 }
  0x2d   : > { %2470 = vmatmul.msk.bf16.vlgmr.msrb.gmra.mxu2 %vm859_vm0, %v846_v14  ;;  %2488 = vmatmul.msk.bf16.vlgmr.msrb.gmra.mxu0 %vm859_vm0, %v846_v14 }
  0x2e   : > { %1127 = vmatpush.bf16.msrb.mxu2 %v2748_v24 }
  0x2f   : > { %2515 = vmatmul.msk.bf16.vlgmr.msrb.gmra.mxu3 %vm859_vm0, %v846_v14  ;;  %2533 = vmatmul.msk.bf16.vlgmr.msrb.gmra.mxu1 %vm859_vm0, %v846_v14 }
  0x32   : > { %1128 = vmatpush.bf16.msrb.mxu2 %v2747_v25 }
  0x3d   : > { %2506 = vmatmul.msk.bf16.vlgmr.msra.gmra.mxu2 %vm859_vm0, %v846_v14  ;;  %2524 = vmatmul.msk.bf16.vlgmr.msra.gmra.mxu0 %vm859_vm0, %v846_v14 }
  0x3f   : > { %2551 = vmatmul.msk.bf16.vlgmr.msra.gmra.mxu3 %vm859_vm0, %v846_v14 }
  0x4d   : > { %2542 = vmatmul.msk.bf16.vlgmr.msrb.gmra.mxu2 %vm859_vm0, %v846_v14  ;;  %v789_v14 = vand.u32 127, %v786_v8 }
  0x4f   : > { %vm790_vm5 = vcmp.le.s32.totalorder %v789_v14, %v787_v13  ;;  %v1411_v13 = vsel %vm1291_vm2, %v843_v12, 0  ;;  %v844_v14 = vld [vmem:[%s3418_s2 + $0xc] sm:$0xf]  ;;  %v2763_v12 = vld [vmem:[%s3384_s12 + $0x20] sm:$0xff] }
  0x50   : > { %vm791_vm6 = vmand %vm785_vm4, %vm790_vm5 }
  0x51   : > { %v792_v17 = vsel %vm791_vm6, 0.0, %v2855_v16 }
  0x9a   : > { %v872_v26 = vpop.f32.mrf.mxu0 }
  0x9b   : > { %v951_v44 = vpack.c.bf16 %v872_v26, %v872_v26 }
  0x9c   : > { %v1001_v27 = vpop.f32.mrf.mxu1 }
  0x9d   : > { %v1056_v28 = vpack.c.bf16 %v1001_v27, %v1001_v27 }
  0x9f   : > { %v1187_v29 = vsel %vm1163_vm1, %v1056_v28, 0 }
  0xa0   : > { %1196 = vmatpush.bf16.xpose.msra.mxu1 %v1187_v29  ;;  %v897_v30 = vpop.f32.mrf.mxu2 }
  0xa1   : > { %v952_v34 = vpack.c.bf16 %v897_v30, %v897_v30 }
  0xa2   : > { %v947_v31 = vpop.f32.mrf.mxu3  ;;  %v874_v32 = vpop.f32.mrf.mxu0 }
  0xa3   : > { %v954_v50 = vpack.c.bf16 %v947_v31, %v947_v31 }
  0xa4   : > { %v1003_v33 = vpop.f32.mrf.mxu1 }
  0xa7   : > { %2553 = vmatmul.msk.bf16.vlgmr.msra.gmra.mxu1 %vm1163_vm1, %v952_v34 }
  0xa8   : > { %v899_v35 = vpop.f32.mrf.mxu2 }
  0xaa   : > { %v949_v36 = vpop.f32.mrf.mxu3  ;;  %v976_v37 = vpop.f32.mrf.mxu0 }
  0xab   : > { %v1055_v38 = vpack.c.bf16 %v976_v37, %v976_v37 }
  0xac   : > { %v1105_v39 = vpop.f32.mrf.mxu1 }
  0xad   : > { %v1160_v40 = vpack.c.bf16 %v1105_v39, %v1105_v39  ;;  %v1168_v41 = vsel %vm1163_vm1, %v1055_v38, 0 }
  0xae   : > { %1177 = vmatpush.bf16.xpose.msrb.mxu0 %v1168_v41 }
  0xaf   : > { %v1312_v42 = vsel %vm1291_vm2, %v1160_v40, 0 }
  0xb0   : > { %1321 = vmatpush.bf16.msrb.mxu1 %v1312_v42  ;;  %v922_v43 = vpop.f32.mrf.mxu2 }
  0xb1   : > { %v953_v57 = vpack.c.bf16 %v922_v43, %v922_v43 }
  0xb2   : > { %v1051_v45 = vpop.f32.mrf.mxu3  ;;  %v978_v47 = vpop.f32.mrf.mxu0 }
  0xb3   : > { %v1058_v46 = vpack.c.bf16 %v1051_v45, %v1051_v45 }
  0xb4   : > { %v1107_v48 = vpop.f32.mrf.mxu1 }
  0xb5   : > { %v1225_v49 = vsel %vm1163_vm1, %v1058_v46, 0  ;;  %2552 = vmatmul.msk.bf16.vlgmr.msrb.gmra.mxu0 %vm1163_vm1, %v951_v44 }
  0xb6   : > { %1234 = vmatpush.bf16.xpose.msrb.mxu3 %v1225_v49 }
  0xb8   : > { %v924_v51 = vpop.f32.mrf.mxu2 }
  0xba   : > { %v1053_v52 = vpop.f32.mrf.mxu3  ;;  %v1080_v58 = vpop.f32.mrf.mxu0 }
  0xbb   : > { %v1159_v59 = vpack.c.bf16 %v1080_v58, %v1080_v58 }
  0xbd   : > { %2555 = vmatmul.msk.bf16.vlgmr.msrb.gmra.mxu3 %vm1163_vm1, %v954_v50  ;;  %v1293_v60 = vsel %vm1291_vm2, %v1159_v59, 0 }
  0xbe   : > { %1302 = vmatpush.bf16.msra.mxu0 %v1293_v60 }
  0xc0   : > { %v1026_v53 = vpop.f32.mrf.mxu2 }
  0xc1   : > { %v1057_v54 = vpack.c.bf16 %v1026_v53, %v1026_v53 }
  0xc2   : > { %v1082_v61 = vpop.f32.mrf.mxu0  ;;  %v1155_v62 = vpop.f32.mrf.mxu3 }
  0xc3   : > { %v1206_v55 = vsel %vm1163_vm1, %v1057_v54, 0  ;;  %v1162_v63 = vpack.c.bf16 %v1155_v62, %v1155_v62 }
  0xc4   : > { %1215 = vmatpush.bf16.xpose.msra.mxu2 %v1206_v55 }
  0xc5   : > { %v1350_v0 = vsel %vm1291_vm2, %v1162_v63, 0 }
  0xc6   : > { %1359 = vmatpush.bf16.msra.mxu3 %v1350_v0 }
  0xc8   : > { %v1028_v56 = vpop.f32.mrf.mxu2 }
  0xca   : > { %v1157_v2 = vpop.f32.mrf.mxu3 }
  0xcb   : > { %2554 = vmatmul.msk.bf16.vlgmr.msra.gmra.mxu2 %vm1163_vm1, %v953_v57 }
  0xd0   : > { %v1130_v1 = vpop.f32.mrf.mxu2 }
  0xd1   : > { %v1161_v3 = vpack.c.bf16 %v1130_v1, %v1130_v1 }
  0xd3   : > { %v1331_v4 = vsel %vm1291_vm2, %v1161_v3, 0 }
  0xd4   : > { %1340 = vmatpush.bf16.msrb.mxu2 %v1331_v4  ;;  %v841_v4 = vld [vmem:[%s3418_s2] sm:$0xf] }
  0xd5   : > { %v1373_v5 = vsel %vm1291_vm2, %v841_v4, 0  ;;  %v2764_v4 = vld [vmem:[%s3384_s12 + $0x28] sm:$0xff] }
  0xd6   : > { %1382 = vmatpush.bf16.msrb.mxu0 %v1373_v5 }
  0xd8   : > { %v1132_v6 = vpop.f32.mrf.mxu2  ;;  %1420 = vmatpush.bf16.msra.mxu2 %v1411_v13  ;;  %v2765_v13 = vld [vmem:[%s3384_s12 + $0x30] sm:$0xff] }
  0xd9   : > { %v842_v6 = vld [vmem:[%s3418_s2 + $0x4] sm:$0xf] }
 0x124   : > { %v1198_v7 = vpop.f32.mrf.mxu1 }
 0x125   : > { %v1199_v21 = vadd.f32 %v1198_v7, %v792_v17  ;;  %v1392_v7 = vsel %vm1291_vm2, %v842_v6, 0  ;;  %v2766_v6 = vld [vmem:[%s3384_s12 + $0x38] sm:$0xff] }
 0x126   : > { %1401 = vmatpush.bf16.msra.mxu1 %v1392_v7  ;;  %v2759_v7 = vld [vmem:[%s3384_s12] sm:$0xff] }
 0x127   : > { %v1243_v23 = vsel %vm1163_vm1, %v1199_v21, -inf }
 0x12c   : > { %v1200_v15 = vpop.f32.mrf.mxu1 }
 0x12d   : > { %v1430_v15 = vsel %vm1291_vm2, %v844_v14, 0 }
 0x12e   : > { %1439 = vmatpush.bf16.msrb.mxu3 %v1430_v15 }
 0x132   : > { %v1179_v18 = vpop.f32.mrf.mxu0 }
 0x133   : > { %v1180_v19 = vadd.f32 %v1179_v18, %v792_v17 }
 0x135   : > { %v1240_v20 = vsel %vm1163_vm1, %v1180_v19, -inf }
 0x136   : > { %1241 = vmax.xlane.f32.xlu1 %v1240_v20 }
 0x13a   : > { %v1181_v22 = vpop.f32.mrf.mxu0 }
 0x13e   : > { %1244 = vmax.xlane.f32.xlu1 %v1243_v23 }
 0x140   : > { %v1236_v24 = vpop.f32.mrf.mxu3 }
 0x141   : > { %v1237_v29 = vadd.f32 %v1236_v24, %v792_v17 }
 0x143   : > { %v1249_v31 = vsel %vm1163_vm1, %v1237_v29, -inf }
 0x148   : > { %v1238_v25 = vpop.f32.mrf.mxu3 }
 0x14e   : > { %v1217_v26 = vpop.f32.mrf.mxu2 }
 0x14f   : > { %v1218_v27 = vadd.f32 %v1217_v26, %v792_v17 }
 0x151   : > { %v1246_v28 = vsel %vm1163_vm1, %v1218_v27, -inf }
 0x152   : > { %1247 = vmax.xlane.f32.xlu0 %v1246_v28 }
 0x156   : > { %v1219_v30 = vpop.f32.mrf.mxu2 }
 0x15a   : > { %1250 = vmax.xlane.f32.xlu0 %v1249_v31 }
 0x1a9   : > { %v1242_v32 = vpop.xlane.xlu1 %1241 }
 0x1aa   : > { %v1252_v33 = vsub.f32 %v1180_v19, %v1242_v32 }
 0x1ac   : > { %v1256_v34 = vmul.f32 1.442695, %v1252_v33 }
 0x1ae   : > { %2806 = vpow2.f32 %v1256_v34 }
 0x1b1   : > { %v1245_v35 = vpop.xlane.xlu1 %1244 }
 0x1b2   : > { %v1253_v36 = vsub.f32 %v1199_v21, %v1245_v35 }
 0x1b4   : > { %v2807_v37 = vpop.eup %2806  ;;  %v1258_v38 = vmul.f32 1.442695, %v1253_v36 }
 0x1b5   : > { %v1264_v39 = vsel %vm1163_vm1, %v2807_v37, 0.0 }
 0x1b6   : > { %2808 = vpow2.f32 %v1258_v38  ;;  %1265 = vadd.xlane.f32.xlu0 %v1264_v39  ;;  %v2796_v39 = vld [vmem:[%s3419_s27] ss:$0 sm:$0xff]  ;;  %s767_s27 = scalar_lea.vmem %s3420_s4, %s3017_s7  ;;  %s3421_s4 = sld [smem:[#allocation6_spill]] }
 0x1bc   : > { %v2809_v40 = vpop.eup %2808 }
 0x1bd   : > { %v1267_v41 = vsel %vm1163_vm1, %v2809_v40, 0.0 }
 0x1be   : > { %1268 = vadd.xlane.f32.xlu1 %v1267_v41 }
 0x1c5   : > { %v1248_v42 = vpop.xlane.xlu0 %1247 }
 0x1c6   : > { %v1254_v43 = vsub.f32 %v1218_v27, %v1248_v42 }
 0x1c8   : > { %v1260_v44 = vmul.f32 1.442695, %v1254_v43 }
 0x1ca   : > { %2810 = vpow2.f32 %v1260_v44 }
 0x1cd   : > { %v1251_v45 = vpop.xlane.xlu0 %1250 }
 0x1ce   : > { %v1255_v46 = vsub.f32 %v1237_v29, %v1251_v45 }
 0x1d0   : > { %v2811_v47 = vpop.eup %2810  ;;  %v1262_v48 = vmul.f32 1.442695, %v1255_v46  ;;  %v2856_v46 = vmov 32.0  }
 0x1d1   : > { %v1270_v49 = vsel %vm1163_vm1, %v2811_v47, 0.0 }
 0x1d2   : > { %2812 = vpow2.f32 %v1262_v48  ;;  %1271 = vadd.xlane.f32.xlu2 %v1270_v49 }
 0x1d8   : > { %v2813_v50 = vpop.eup %2812 }
 0x1d9   : > { %v1273_v51 = vsel %vm1163_vm1, %v2813_v50, 0.0 }
 0x1da   : > { %1274 = vadd.xlane.f32.xlu2 %v1273_v51 }
 0x229   : > { %v1266_v52 = vpop.xlane.xlu0 %1265 }
 0x22a   : > { %2814 = vrcp.f32 %v1266_v52 }
 0x230   : > { %v2815_v53 = vpop.eup %2814 }
 0x231   : > { %v1280_v54 = vmul.f32 %v2815_v53, %v2807_v37  ;;  %v1269_v55 = vpop.xlane.xlu1 %1268 }
 0x232   : > { %2816 = vrcp.f32 %v1269_v55 }
 0x233   : > { %v1284_v56 = vpack.c.bf16 %v1280_v54, %v1280_v54 }
 0x235   : > { %2556 = vmatmul.msk.bf16.vlgmr.msra.gmra.mxu0 %vm1163_vm1, %v1284_v56 }
 0x238   : > { %v2817_v57 = vpop.eup %2816 }
 0x239   : > { %v1281_v58 = vmul.f32 %v2817_v57, %v2809_v40  ;;  %v2752_v57 = vld [vmem:[%s3383_s11 + $0x8] sm:$0xff] }
 0x23a   : > { %1578 = vmatpush.bf16.msra.mxu0 %v2752_v57 }
 0x23b   : > { %v1285_v59 = vpack.c.bf16 %v1281_v58, %v1281_v58  ;;  %v2754_v58 = vld [vmem:[%s3383_s11 + $0x18] sm:$0xff] }
 0x23d   : > { %2557 = vmatmul.msk.bf16.vlgmr.msrb.gmra.mxu1 %vm1163_vm1, %v1285_v59  ;;  %v2756_v59 = vld [vmem:[%s3383_s11 + $0x28] sm:$0xff] }
 0x23e   : > { %1603 = vmatpush.bf16.msrb.mxu1 %v2754_v58 }
 0x245   : > { %v1272_v60 = vpop.xlane.xlu2 %1271 }
 0x246   : > { %2818 = vrcp.f32 %v1272_v60  ;;  %v2758_v60 = vld [vmem:[%s3383_s11 + $0x38] sm:$0xff] }
 0x24c   : > { %v2819_v61 = vpop.eup %2818 }
 0x24d   : > { %v1282_v62 = vmul.f32 %v2819_v61, %v2811_v47  ;;  %v1275_v63 = vpop.xlane.xlu2 %1274  ;;  %v2751_v61 = vld [vmem:[%s3383_s11] sm:$0xff] }
 0x24e   : > { %2820 = vrcp.f32 %v1275_v63  ;;  %v2755_v63 = vld [vmem:[%s3383_s11 + $0x20] sm:$0xff]  ;;  %1579 = vmatpush.bf16.msra.mxu0 %v2751_v61 }
 0x24f   : > { %v1286_v0 = vpack.c.bf16 %v1282_v62, %v1282_v62  ;;  %2822 = vrcp.f32 %v2856_v46  ;;  %v2753_v62 = vld [vmem:[%s3383_s11 + $0x10] sm:$0xff] }
 0x250   : > { %1604 = vmatpush.bf16.msrb.mxu1 %v2753_v62 }
 0x251   : > { %2558 = vmatmul.msk.bf16.vlgmr.msrb.gmra.mxu2 %vm1163_vm1, %v1286_v0  ;;  %v2757_v0 = vld [vmem:[%s3383_s11 + $0x30] sm:$0xff] }
 0x252   : > { %1628 = vmatpush.bf16.msrb.mxu2 %v2756_v59 }
 0x254   : > { %v2821_v1 = vpop.eup %2820 }
 0x255   : > { %v1283_v2 = vmul.f32 %v2821_v1, %v2813_v50  ;;  %v2823_v47 = vpop.eup %2822 }
 0x256   : > { %v1463_v48 = vmul.f32 32.0, %v2823_v47  ;;  %vm1467_vm7 = vweird.f32 %v2823_v47  ;;  %1629 = vmatpush.bf16.msrb.mxu2 %v2755_v63 }
 0x257   : > { %v1287_v3 = vpack.c.bf16 %v1283_v2, %v1283_v2  ;;  %v2760_v2 = vld [vmem:[%s3384_s12 + $0x8] sm:$0xff] }
 0x258   : > { %v1464_v49 = vsub.f32 1.0, %v1463_v48 }
 0x259   : > { %2559 = vmatmul.msk.bf16.vlgmr.msra.gmra.mxu3 %vm1163_vm1, %v1287_v3  ;;  %v2762_v3 = vld [vmem:[%s3384_s12 + $0x18] sm:$0xff] }
 0x25a   : > { %v1465_v50 = vmul.f32 %v2823_v47, %v1464_v49  ;;  %1653 = vmatpush.bf16.msra.mxu3 %v2758_v60 }
 0x25c   : > { %v1466_v51 = vadd.f32 %v2823_v47, %v1465_v50 }
 0x25e   : > { %v3146_v52 = vsel %vm1467_vm7, %v2823_v47, %v1466_v51  ;;  %1654 = vmatpush.bf16.msra.mxu3 %v2757_v0 }
 0x2b2   : > { %v1304_v8 = vpop.f32.mrf.mxu0 }
 0x2b3   : > { %v1365_v10 = vpack.c.bf16 %v1304_v8, %v1304_v8  ;;  %v2761_v8 = vld [vmem:[%s3384_s12 + $0x10] sm:$0xff] }
 0x2b5   : > { %2560 = vmatmul.msk.bf16.vlgmr.msrb.gmra.mxu0 %vm1163_vm1, %v1365_v10 }
 0x2b6   : > { %1685 = vmatpush.bf16.msrb.mxu0 %v2760_v2 }
 0x2ba   : > { %v1306_v17 = vpop.f32.mrf.mxu0  ;;  %v1323_v18 = vpop.f32.mrf.mxu1  ;;  %1686 = vmatpush.bf16.msrb.mxu0 %v2759_v7 }
 0x2bb   : > { %v1366_v19 = vpack.c.bf16 %v1323_v18, %v1323_v18 }
 0x2bd   : > { %2561 = vmatmul.msk.bf16.vlgmr.msra.gmra.mxu1 %vm1163_vm1, %v1366_v19 }
 0x2be   : > { %1710 = vmatpush.bf16.msra.mxu1 %v2762_v3 }
 0x2c2   : > { %v1325_v20 = vpop.f32.mrf.mxu1  ;;  %1711 = vmatpush.bf16.msra.mxu1 %v2761_v8 }
 0x2d4   : > { %v1342_v21 = vpop.f32.mrf.mxu2 }
 0x2d5   : > { %v1367_v22 = vpack.c.bf16 %v1342_v21, %v1342_v21  ;;  %v2797_v21 = vld [vmem:[%s3381_s9] ss:$0 sm:$0xff] }
 0x2d7   : > { %2562 = vmatmul.msk.bf16.vlgmr.msra.gmra.mxu2 %vm1163_vm1, %v1367_v22 }
 0x2d8   : > { %1735 = vmatpush.bf16.msra.mxu2 %v2764_v4 }
 0x2dc   : > { %v1344_v23 = vpop.f32.mrf.mxu2  ;;  %v1361_v24 = vpop.f32.mrf.mxu3  ;;  %1736 = vmatpush.bf16.msra.mxu2 %v2763_v12 }
 0x2dd   : > { %v1368_v25 = vpack.c.bf16 %v1361_v24, %v1361_v24  ;;  %v2798_v23 = vld [vmem:[%s3382_s10] ss:$0 sm:$0xff] }
 0x2df   : > { %2563 = vmatmul.msk.bf16.vlgmr.msrb.gmra.mxu3 %vm1163_vm1, %v1368_v25 }
 0x2e0   : > { %1760 = vmatpush.bf16.msrb.mxu3 %v2766_v6 }
 0x2e4   : > { %v1363_v26 = vpop.f32.mrf.mxu3  ;;  %1761 = vmatpush.bf16.msrb.mxu3 %v2765_v13 }
 0x332   : > { %v1384_v27 = vpop.f32.mrf.mxu0 }
 0x333   : > { %v1445_v33 = vsel %vm859_vm0, %v1384_v27, 0.0 }
 0x33a   : > { %v1386_v28 = vpop.f32.mrf.mxu0  ;;  %v1403_v29 = vpop.f32.mrf.mxu1 }
 0x33b   : > { %v1446_v32 = vsel %vm859_vm0, %v1403_v29, 0.0  ;;  %v780_v28 = vld [vmem:[%s767_s27] sm:$0xff]  ;;  %s773_s27 = scalar_lea.vmem %s3421_s4, %s3425_s26  ;;  %s3422_s26 = sld [smem:[#allocation12_spill]] }
 0x33c   : > { %v1447_v35 = vadd.f32 %v1446_v32, %v1445_v33  ;;  %v1556_v29 = vpack.c.bf16 %v780_v28, %v780_v28  ;;  %v2772_v32 = vld [vmem:[%s3385_s13 + $0x28] sm:$0xff]  ;;  %v2774_v33 = vld [vmem:[%s3385_s13 + $0x38] sm:$0xff] }
 0x341   : > { %s777_s28 = scalar_lea.vmem %s3422_s26, %s3017_s7 }
 0x342   : > { %v1405_v30 = vpop.f32.mrf.mxu1 }
 0x343   : > { %v2768_v30 = vld [vmem:[%s3385_s13 + $0x8] sm:$0xff] }
 0x35a   : > { %v1422_v31 = vpop.f32.mrf.mxu2 }
 0x35b   : > { %v1448_v34 = vsel %vm859_vm0, %v1422_v31, 0.0  ;;  %v2770_v31 = vld [vmem:[%s3385_s13 + $0x18] sm:$0xff] }
 0x35c   : > { %v1449_v36 = vadd.f32 %v1448_v34, %v1447_v35  ;;  %v2771_v34 = vld [vmem:[%s3385_s13 + $0x20] sm:$0xff] }
 0x35d   : > { %v2767_v35 = vld [vmem:[%s3385_s13] sm:$0xff] }
 0x362   : > { %v1424_v37 = vpop.f32.mrf.mxu2  ;;  %v1441_v38 = vpop.f32.mrf.mxu3 }
 0x363   : > { %v1450_v40 = vsel %vm859_vm0, %v1441_v38, 0.0  ;;  %v2773_v37 = vld [vmem:[%s3385_s13 + $0x30] sm:$0xff] }
 0x364   : > { %v1451_v41 = vadd.f32 %v1450_v40, %v1449_v36  ;;  %v2769_v36 = vld [vmem:[%s3385_s13 + $0x10] sm:$0xff] }
 0x366   : > { %v1455_v42 = vadd.f32 %v2796_v39, %v1451_v41 }
 0x368   : > { %v1456_v43 = vadd.f32 %v1455_v42, %v3032_v11 }
 0x36a   : > { %v1443_v44 = vpop.f32.mrf.mxu3  ;;  %v1459_v45 = vsel %vm859_vm0, %v1456_v43, 0.0 }
 0x36b   : > { %1460 = vadd.xlane.f32.xlu2 %v1459_v45 }
 0x3de   : > { %v1461_v53 = vpop.xlane.xlu2 %1460 }
 0x3df   : > { %v1469_v54 = vmul.f32 %v3146_v52, %v1461_v53 }
 0x3e1   : > { %v1470_v55 = vsub.f32 %v1456_v43, %v1469_v54 }
 0x3e3   : > { %v1471_v56 = vmul.f32 %v1470_v55, %v1470_v55 }
 0x3e5   : > { %v1472_v11 = vsel %vm859_vm0, %v1471_v56, 0.0 }
 0x3e6   : > { %1473 = vadd.xlane.f32.xlu0 %v1472_v11 }
 0x459   : > { %v1474_v1 = vpop.xlane.xlu0 %1473 }
 0x45a   : > { %v1475_v5 = vmul.f32 %v1474_v1, %v3146_v52 }
 0x45c   : > { %v1476_v10 = vadd.f32 1e-05, %v1475_v5 }
 0x45e   : > { %2824 = vrsqrt.f32 %v1476_v10  ;;  %vm1483_vm9 = vweird.f32 %v1476_v10 }
 0x464   : > { %v2825_v14 = vpop.eup %2824 }
 0x465   : > { %v1478_v15 = vmul.f32 %v2825_v14, %v1476_v10  ;;  %vm1484_vm8 = vweird.f32 %v2825_v14 }
 0x466   : > { %vm1485_vm10 = vmor %vm1483_vm9, %vm1484_vm8 }
 0x467   : > { %v1479_v17 = vmul.f32 %v2825_v14, %v1478_v15 }
 0x469   : > { %v1480_v18 = vmul.f32 0.5, %v1479_v17 }
 0x46b   : > { %v1481_v19 = vsub.f32 1.5, %v1480_v18 }
 0x46d   : > { %v1482_v20 = vmul.f32 %v2825_v14, %v1481_v19 }
 0x46f   : > { %v1486_v22 = vsel %vm1485_vm10, %v2825_v14, %v1482_v20 }
 0x470   : > { %v1487_v24 = vmul.f32 %v1486_v22, %v1470_v55 }
 0x472   : > { %v1491_v25 = vmul.f32 %v2797_v21, %v1487_v24  ;;  %v1496_v21 = vld [vmem:[%s773_s27] sm:$0x1] }
 0x473   : > { %vm1497_vm11 = vcmp.gt.f32.partialorder %v1496_v21, 0.5  ;;  %v1551_v21 = vld [vmem:[%s3386_s14 + $0x4] sm:$0xf] }
 0x474   : > { %v3205_v26 = vadd.f32 %v2798_v23, %v1491_v25  ;;  %v1498_v22 = vsel %vm1497_vm11, 1, %v2854_v9 }
 0x475   : > { %v1499_v23 = vperm.slane %v1498_v22, 0  ;;  %v2102_v22 = vsel %vm1291_vm2, %v1551_v21, 0  ;;  %v2777_v21 = vld [vmem:[%s3392_s20] sm:$0xff] }
 0x476   : > { %v1555_v27 = vpack.c.bf16 %v3205_v26, %v3205_v26 }
 0x477   : > { %vm1500_vm12 = vcmp.eq.s32.totalorder %v1499_v23, 1 }
 0x478   : > { %2572 = vmatmul.msk.bf16.vlgmr.msra.gmra.mxu0 %vm859_vm0, %v1555_v27  ;;  %2581 = vmatmul.msk.bf16.vlgmr.msrb.gmra.mxu1 %vm859_vm0, %v1555_v27  ;;  %v1501_v24 = vsel %vm1500_vm12, 0.0, %v2855_v16 }
 0x479   : > { %2590 = vmatmul.msk.bf16.vlgmr.msrb.gmra.mxu2 %vm859_vm0, %v1555_v27  ;;  %2599 = vmatmul.msk.bf16.vlgmr.msra.gmra.mxu3 %vm859_vm0, %v1555_v27 }
 0x47a   : > { %1789 = vmatpush.bf16.msra.mxu0 %v2768_v30  ;;  %1814 = vmatpush.bf16.msrb.mxu1 %v2770_v31 }
 0x47b   : > { %1839 = vmatpush.bf16.msrb.mxu2 %v2772_v32  ;;  %1864 = vmatpush.bf16.msra.mxu3 %v2774_v33 }
 0x47e   : > { %1790 = vmatpush.bf16.msra.mxu0 %v2767_v35  ;;  %1815 = vmatpush.bf16.msrb.mxu1 %v2769_v36 }
 0x47f   : > { %1840 = vmatpush.bf16.msrb.mxu2 %v2771_v34  ;;  %1865 = vmatpush.bf16.msra.mxu3 %v2773_v37 }
 0x488   : > { %2608 = vmatmul.msk.bf16.vlgmr.msrb.gmra.mxu0 %vm859_vm0, %v1556_v29  ;;  %2617 = vmatmul.msk.bf16.vlgmr.msra.gmra.mxu1 %vm859_vm0, %v1556_v29 }
 0x489   : > { %2626 = vmatmul.msk.bf16.vlgmr.msra.gmra.mxu2 %vm859_vm0, %v1556_v29  ;;  %2635 = vmatmul.msk.bf16.vlgmr.msrb.gmra.mxu3 %vm859_vm0, %v1556_v29 }
 0x498   : > { %2644 = vmatmul.msk.bf16.vlgmr.msra.gmra.mxu0 %vm859_vm0, %v1556_v29  ;;  %2653 = vmatmul.msk.bf16.vlgmr.msrb.gmra.mxu1 %vm859_vm0, %v1556_v29 }
 0x499   : > { %2662 = vmatmul.msk.bf16.vlgmr.msrb.gmra.mxu2 %vm859_vm0, %v1556_v29  ;;  %2671 = vmatmul.msk.bf16.vlgmr.msra.gmra.mxu3 %vm859_vm0, %v1556_v29 }
 0x4f5   : > { %v1581_v38 = vpop.f32.mrf.mxu0  ;;  %v1606_v39 = vpop.f32.mrf.mxu1 }
 0x4f6   : > { %v1660_v58 = vpack.c.bf16 %v1581_v38, %v1581_v38  ;;  %v1661_v59 = vpack.c.bf16 %v1606_v39, %v1606_v39 }
 0x4fc   : > { %v1631_v40 = vpop.f32.mrf.mxu2  ;;  %v1656_v41 = vpop.f32.mrf.mxu3 }
 0x4fd   : > { %v1583_v42 = vpop.f32.mrf.mxu0  ;;  %v1608_v43 = vpop.f32.mrf.mxu1  ;;  %v1662_v0 = vpack.c.bf16 %v1631_v40, %v1631_v40  ;;  %v1663_v1 = vpack.c.bf16 %v1656_v41, %v1656_v41 }
 0x504   : > { %v1633_v44 = vpop.f32.mrf.mxu2  ;;  %v1658_v45 = vpop.f32.mrf.mxu3 }
 0x505   : > { %v1688_v46 = vpop.f32.mrf.mxu0  ;;  %v1713_v47 = vpop.f32.mrf.mxu1 }
 0x506   : > { %v1767_v48 = vpack.c.bf16 %v1688_v46, %v1688_v46  ;;  %v1768_v49 = vpack.c.bf16 %v1713_v47, %v1713_v47 }
 0x508   : > { %v1879_v50 = vsel %vm1163_vm1, %v1767_v48, 0  ;;  %v1898_v51 = vsel %vm1163_vm1, %v1768_v49, 0 }
 0x509   : > { %1888 = vmatpush.bf16.xpose.msrb.mxu0 %v1879_v50  ;;  %1907 = vmatpush.bf16.xpose.msra.mxu1 %v1898_v51 }
 0x50c   : > { %v1738_v53 = vpop.f32.mrf.mxu2  ;;  %v1763_v54 = vpop.f32.mrf.mxu3 }
 0x50d   : > { %v1769_v55 = vpack.c.bf16 %v1738_v53, %v1738_v53  ;;  %v1770_v56 = vpack.c.bf16 %v1763_v54, %v1763_v54  ;;  %v1690_v11 = vpop.f32.mrf.mxu0  ;;  %v1715_v57 = vpop.f32.mrf.mxu1 }
 0x50f   : > { %v1917_v60 = vsel %vm1163_vm1, %v1769_v55, 0  ;;  %v1936_v61 = vsel %vm1163_vm1, %v1770_v56, 0 }
 0x510   : > { %1926 = vmatpush.bf16.xpose.msra.mxu2 %v1917_v60  ;;  %1945 = vmatpush.bf16.xpose.msrb.mxu3 %v1936_v61 }
 0x511   : > { %2672 = vmatmul.msk.bf16.vlgmr.msrb.gmra.mxu0 %vm1163_vm1, %v1660_v58  ;;  %2673 = vmatmul.msk.bf16.vlgmr.msra.gmra.mxu1 %vm1163_vm1, %v1661_v59 }
 0x514   : > { %v1740_v62 = vpop.f32.mrf.mxu2  ;;  %v1765_v63 = vpop.f32.mrf.mxu3 }
 0x515   : > { %v1792_v2 = vpop.f32.mrf.mxu0  ;;  %v1817_v3 = vpop.f32.mrf.mxu1 }
 0x516   : > { %v1871_v4 = vpack.c.bf16 %v1792_v2, %v1792_v2  ;;  %v1872_v5 = vpack.c.bf16 %v1817_v3, %v1817_v3 }
 0x517   : > { %2674 = vmatmul.msk.bf16.vlgmr.msra.gmra.mxu2 %vm1163_vm1, %v1662_v0  ;;  %2675 = vmatmul.msk.bf16.vlgmr.msrb.gmra.mxu3 %vm1163_vm1, %v1663_v1 }
 0x518   : > { %v2003_v6 = vsel %vm1291_vm2, %v1871_v4, 0  ;;  %v2022_v7 = vsel %vm1291_vm2, %v1872_v5, 0 }
 0x519   : > { %2012 = vmatpush.bf16.msra.mxu0 %v2003_v6  ;;  %2031 = vmatpush.bf16.msrb.mxu1 %v2022_v7 }
 0x51c   : > { %v1842_v8 = vpop.f32.mrf.mxu2  ;;  %v1867_v12 = vpop.f32.mrf.mxu3 }
 0x51d   : > { %v1873_v10 = vpack.c.bf16 %v1842_v8, %v1842_v8  ;;  %v1794_v13 = vpop.f32.mrf.mxu0  ;;  %v1819_v14 = vpop.f32.mrf.mxu1  ;;  %v1874_v17 = vpack.c.bf16 %v1867_v12, %v1867_v12  ;;  %2111 = vmatpush.bf16.msra.mxu1 %v2102_v22  ;;  %v2802_v22 = vld [vmem:[%s3391_s19] ss:$0 sm:$0xff] }
 0x51e   : > { %v1550_v14 = vld [vmem:[%s3386_s14] sm:$0xf] }
 0x51f   : > { %v2041_v15 = vsel %vm1291_vm2, %v1873_v10, 0  ;;  %v2060_v18 = vsel %vm1291_vm2, %v1874_v17, 0  ;;  %v1552_v17 = vld [vmem:[%s3386_s14 + $0x8] sm:$0xf] }
 0x520   : > { %2050 = vmatpush.bf16.msrb.mxu2 %v2041_v15  ;;  %2069 = vmatpush.bf16.msra.mxu3 %v2060_v18  ;;  %v2083_v15 = vsel %vm1291_vm2, %v1550_v14, 0  ;;  %v1553_v18 = vld [vmem:[%s3386_s14 + $0xc] sm:$0xf]  ;;  %v2801_v14 = vld [vmem:[%s3389_s17] ss:$0 sm:$0xff] }
 0x521   : > { %2092 = vmatpush.bf16.msrb.mxu0 %v2083_v15 }
 0x524   : > { %v1844_v19 = vpop.f32.mrf.mxu2  ;;  %v1869_v20 = vpop.f32.mrf.mxu3 }
 0x525   : > { %v2121_v19 = vsel %vm1291_vm2, %v1552_v17, 0  ;;  %v2140_v20 = vsel %vm1291_vm2, %v1553_v18, 0 }
 0x526   : > { %2130 = vmatpush.bf16.msra.mxu2 %v2121_v19  ;;  %2149 = vmatpush.bf16.msrb.mxu3 %v2140_v20  ;;  %v2778_v20 = vld [vmem:[%s3392_s20 + $0x8] sm:$0xff] }
 0x58e   : > { %v1890_v25 = vpop.f32.mrf.mxu0  ;;  %v1909_v27 = vpop.f32.mrf.mxu1 }
 0x58f   : > { %v1891_v28 = vadd.f32 %v1890_v25, %v1501_v24  ;;  %v1910_v37 = vadd.f32 %v1909_v27, %v1501_v24 }
 0x591   : > { %v1951_v29 = vsel %vm1163_vm1, %v1891_v28, -inf  ;;  %v1954_v39 = vsel %vm1163_vm1, %v1910_v37, -inf }
 0x592   : > { %1952 = vmax.xlane.f32.xlu0 %v1951_v29 }
 0x596   : > { %v1892_v30 = vpop.f32.mrf.mxu0  ;;  %v1911_v31 = vpop.f32.mrf.mxu1 }
 0x59a   : > { %v1928_v32 = vpop.f32.mrf.mxu2  ;;  %v1947_v33 = vpop.f32.mrf.mxu3 }
 0x59b   : > { %v1929_v34 = vadd.f32 %v1928_v32, %v1501_v24  ;;  %v1948_v35 = vadd.f32 %v1947_v33, %v1501_v24 }
 0x59d   : > { %v1960_v36 = vsel %vm1163_vm1, %v1948_v35, -inf  ;;  %v1957_v9 = vsel %vm1163_vm1, %v1929_v34, -inf }
 0x59e   : > { %1961 = vmax.xlane.f32.xlu2 %v1960_v36  ;;  %1958 = vmax.xlane.f32.xlu1 %v1957_v9 }
 0x5a2   : > { %v1930_v16 = vpop.f32.mrf.mxu2  ;;  %v1949_v38 = vpop.f32.mrf.mxu3 }
 0x5a6   : > { %1955 = vmax.xlane.f32.xlu1 %v1954_v39 }
 0x605   : > { %v1953_v40 = vpop.xlane.xlu0 %1952 }
 0x606   : > { %v1963_v41 = vsub.f32 %v1891_v28, %v1953_v40 }
 0x608   : > { %v1967_v42 = vmul.f32 1.442695, %v1963_v41 }
 0x60a   : > { %2826 = vpow2.f32 %v1967_v42 }
 0x610   : > { %v2827_v43 = vpop.eup %2826 }
 0x611   : > { %v1962_v44 = vpop.xlane.xlu2 %1961  ;;  %v1959_v45 = vpop.xlane.xlu1 %1958  ;;  %v1975_v46 = vsel %vm1163_vm1, %v2827_v43, 0.0 }
 0x612   : > { %v1966_v47 = vsub.f32 %v1948_v35, %v1962_v44  ;;  %v1965_v48 = vsub.f32 %v1929_v34, %v1959_v45  ;;  %1976 = vadd.xlane.f32.xlu1 %v1975_v46  ;;  %v2799_v44 = vld [vmem:[%s3387_s15] ss:$0 sm:$0xff] }
 0x614   : > { %v1973_v49 = vmul.f32 1.442695, %v1966_v47  ;;  %v1971_v50 = vmul.f32 1.442695, %v1965_v48 }
 0x616   : > { %2828 = vpow2.f32 %v1973_v49 }
 0x617   : > { %2830 = vpow2.f32 %v1971_v50 }
 0x619   : > { %v1956_v51 = vpop.xlane.xlu1 %1955 }
 0x61a   : > { %v1964_v53 = vsub.f32 %v1910_v37, %v1956_v51 }
 0x61c   : > { %v2829_v54 = vpop.eup %2828  ;;  %v1969_v55 = vmul.f32 1.442695, %v1964_v53 }
 0x61d   : > { %v2831_v56 = vpop.eup %2830  ;;  %v1984_v11 = vsel %vm1163_vm1, %v2829_v54, 0.0 }
 0x61e   : > { %2832 = vpow2.f32 %v1969_v55  ;;  %v1981_v57 = vsel %vm1163_vm1, %v2831_v56, 0.0  ;;  %1985 = vadd.xlane.f32.xlu0 %v1984_v11 }
 0x61f   : > { %1982 = vadd.xlane.f32.xlu2 %v1981_v57 }
 0x624   : > { %v2833_v58 = vpop.eup %2832 }
 0x625   : > { %v1978_v59 = vsel %vm1163_vm1, %v2833_v58, 0.0 }
 0x627   : > { %1979 = vadd.xlane.f32.xlu2 %v1978_v59  ;;  %v2784_v59 = vld [vmem:[%s3392_s20 + $0x38] sm:$0xff] }
 0x685   : > { %v1977_v60 = vpop.xlane.xlu1 %1976 }
 0x686   : > { %2834 = vrcp.f32 %v1977_v60 }
 0x68c   : > { %v2835_v61 = vpop.eup %2834 }
 0x68d   : > { %v1991_v62 = vmul.f32 %v2835_v61, %v2827_v43 }
 0x68f   : > { %v1995_v63 = vpack.c.bf16 %v1991_v62, %v1991_v62  ;;  %v2783_v62 = vld [vmem:[%s3392_s20 + $0x30] sm:$0xff] }
 0x691   : > { %v1986_v0 = vpop.xlane.xlu0 %1985  ;;  %2676 = vmatmul.msk.bf16.vlgmr.msra.gmra.mxu0 %vm1163_vm1, %v1995_v63 }
 0x692   : > { %v1983_v1 = vpop.xlane.xlu2 %1982  ;;  %2836 = vrcp.f32 %v1986_v0  ;;  %v2782_v0 = vld [vmem:[%s3392_s20 + $0x28] sm:$0xff] }
 0x693   : > { %2838 = vrcp.f32 %v1983_v1  ;;  %v2781_v1 = vld [vmem:[%s3392_s20 + $0x20] sm:$0xff] }
 0x698   : > { %v2837_v2 = vpop.eup %2836 }
 0x699   : > { %v2839_v3 = vpop.eup %2838  ;;  %v1994_v4 = vmul.f32 %v2837_v2, %v2829_v54 }
 0x69a   : > { %v1993_v5 = vmul.f32 %v2839_v3, %v2831_v56  ;;  %v1980_v6 = vpop.xlane.xlu2 %1979 }
 0x69b   : > { %v1998_v7 = vpack.c.bf16 %v1994_v4, %v1994_v4  ;;  %2840 = vrcp.f32 %v1980_v6  ;;  %v2780_v4 = vld [vmem:[%s3392_s20 + $0x18] sm:$0xff] }
 0x69c   : > { %v1997_v8 = vpack.c.bf16 %v1993_v5, %v1993_v5 }
 0x69d   : > { %2679 = vmatmul.msk.bf16.vlgmr.msra.gmra.mxu3 %vm1163_vm1, %v1998_v7  ;;  %v2779_v7 = vld [vmem:[%s3392_s20 + $0x10] sm:$0xff] }
 0x69e   : > { %2678 = vmatmul.msk.bf16.vlgmr.msrb.gmra.mxu2 %vm1163_vm1, %v1997_v8 }
 0x6a1   : > { %v2841_v10 = vpop.eup %2840 }
 0x6a2   : > { %v1992_v12 = vmul.f32 %v2841_v10, %v2833_v58  ;;  %v2776_v58 = vld [vmem:[%s3390_s18 + $0x8] sm:$0xff] }
 0x6a3   : > { %2246 = vmatpush.bf16.msra.mxu0 %v2776_v58 }
 0x6a4   : > { %v1996_v13 = vpack.c.bf16 %v1992_v12, %v1992_v12  ;;  %v2800_v12 = vld [vmem:[%s3388_s16] ss:$0 sm:$0xff] }
 0x6a6   : > { %2677 = vmatmul.msk.bf16.vlgmr.msrb.gmra.mxu1 %vm1163_vm1, %v1996_v13 }
 0x6a7   : > { %2306 = vmatpush.bf16.msrb.mxu1 %v2784_v59 }
 0x6ab   : > { %2307 = vmatpush.bf16.msrb.mxu1 %v2783_v62 }
 0x6af   : > { %2308 = vmatpush.bf16.msrb.mxu1 %v2782_v0 }
 0x6b3   : > { %2309 = vmatpush.bf16.msrb.mxu1 %v2781_v1 }
 0x6b7   : > { %2310 = vmatpush.bf16.msrb.mxu1 %v2780_v4 }
 0x6bb   : > { %2311 = vmatpush.bf16.msrb.mxu1 %v2779_v7 }
 0x6bf   : > { %2312 = vmatpush.bf16.msrb.mxu1 %v2778_v20 }
 0x6c3   : > { %2313 = vmatpush.bf16.msrb.mxu1 %v2777_v21 }
 0x70e   : > { %v2014_v23 = vpop.f32.mrf.mxu0 }
 0x70f   : > { %v2075_v24 = vpack.c.bf16 %v2014_v23, %v2014_v23 }
 0x711   : > { %2680 = vmatmul.msk.bf16.vlgmr.msrb.gmra.mxu0 %vm1163_vm1, %v2075_v24 }
 0x716   : > { %v2016_v25 = vpop.f32.mrf.mxu0 }
 0x720   : > { %v2071_v27 = vpop.f32.mrf.mxu3 }
 0x721   : > { %v2052_v28 = vpop.f32.mrf.mxu2  ;;  %v2078_v29 = vpack.c.bf16 %v2071_v27, %v2071_v27 }
 0x722   : > { %v2077_v30 = vpack.c.bf16 %v2052_v28, %v2052_v28 }
 0x723   : > { %v2033_v31 = vpop.f32.mrf.mxu1  ;;  %2683 = vmatmul.msk.bf16.vlgmr.msrb.gmra.mxu3 %vm1163_vm1, %v2078_v29  ;;  %v2803_v29 = vld [vmem:[%s3393_s21] ss:$0 sm:$0xff] }
 0x724   : > { %v2076_v32 = vpack.c.bf16 %v2033_v31, %v2033_v31  ;;  %2682 = vmatmul.msk.bf16.vlgmr.msra.gmra.mxu2 %vm1163_vm1, %v2077_v30 }
 0x726   : > { %2681 = vmatmul.msk.bf16.vlgmr.msra.gmra.mxu1 %vm1163_vm1, %v2076_v32 }
 0x728   : > { %v2073_v33 = vpop.f32.mrf.mxu3 }
 0x729   : > { %v2054_v34 = vpop.f32.mrf.mxu2 }
 0x72b   : > { %v2035_v35 = vpop.f32.mrf.mxu1 }
 0x78e   : > { %v2094_v36 = vpop.f32.mrf.mxu0 }
 0x78f   : > { %v2155_v38 = vsel %vm859_vm0, %v2094_v36, 0.0 }
 0x796   : > { %v2096_v9 = vpop.f32.mrf.mxu0 }
 0x7a3   : > { %v2113_v37 = vpop.f32.mrf.mxu1 }
 0x7a4   : > { %v2156_v16 = vsel %vm859_vm0, %v2113_v37, 0.0 }
 0x7a5   : > { %v2157_v40 = vadd.f32 %v2156_v16, %v2155_v38 }
 0x7a6   : > { %v2151_v39 = vpop.f32.mrf.mxu3 }
 0x7a7   : > { %v2132_v41 = vpop.f32.mrf.mxu2  ;;  %v2160_v45 = vsel %vm859_vm0, %v2151_v39, 0.0 }
 0x7a8   : > { %v2158_v42 = vsel %vm859_vm0, %v2132_v41, 0.0 }
 0x7a9   : > { %v2159_v43 = vadd.f32 %v2158_v42, %v2157_v40 }
 0x7ab   : > { %v2161_v46 = vadd.f32 %v2160_v45, %v2159_v43  ;;  %v2115_v47 = vpop.f32.mrf.mxu1 }
 0x7ac   : > { %v2804_v47 = vld [vmem:[%s3394_s22] ss:$0 sm:$0xff] }
 0x7ad   : > { %v2165_v48 = vadd.f32 %v2799_v44, %v2161_v46 }
 0x7ae   : > { %v2153_v49 = vpop.f32.mrf.mxu3 }
 0x7af   : > { %v2134_v50 = vpop.f32.mrf.mxu2  ;;  %v2166_v51 = vadd.f32 %v2165_v48, %v3205_v26  ;;  %v2775_v26 = vld [vmem:[%s3390_s18] sm:$0xff] }
 0x7b0   : > { %2247 = vmatpush.bf16.msra.mxu0 %v2775_v26 }
 0x7b1   : > { %v2169_v53 = vsel %vm859_vm0, %v2166_v51, 0.0 }
 0x7b2   : > { %2170 = vadd.xlane.f32.xlu0 %v2169_v53 }
 0x825   : > { %v2171_v54 = vpop.xlane.xlu0 %2170 }
 0x826   : > { %v2172_v55 = vmul.f32 %v2171_v54, %v3146_v52 }
 0x828   : > { %v2173_v56 = vsub.f32 %v2166_v51, %v2172_v55 }
 0x82a   : > { %v2174_v11 = vmul.f32 %v2173_v56, %v2173_v56 }
 0x82c   : > { %v2175_v57 = vsel %vm859_vm0, %v2174_v11, 0.0 }
 0x82d   : > { %2176 = vadd.xlane.f32.xlu1 %v2175_v57 }
 0x8a0   : > { %v2177_v60 = vpop.xlane.xlu1 %2176 }
 0x8a1   : > { %v2178_v61 = vmul.f32 %v2177_v60, %v3146_v52 }
 0x8a3   : > { %v2179_v63 = vadd.f32 1e-05, %v2178_v61 }
 0x8a5   : > { %2842 = vrsqrt.f32 %v2179_v63  ;;  %vm2186_vm14 = vweird.f32 %v2179_v63 }
 0x8ab   : > { %v2843_v2 = vpop.eup %2842 }
 0x8ac   : > { %v2181_v3 = vmul.f32 %v2843_v2, %v2179_v63  ;;  %vm2187_vm13 = vweird.f32 %v2843_v2 }
 0x8ad   : > { %vm2188_vm15 = vmor %vm2186_vm14, %vm2187_vm13 }
 0x8ae   : > { %v2182_v5 = vmul.f32 %v2843_v2, %v2181_v3 }
 0x8b0   : > { %v2183_v6 = vmul.f32 0.5, %v2182_v5 }
 0x8b2   : > { %v2184_v8 = vsub.f32 1.5, %v2183_v6 }
 0x8b4   : > { %v2185_v10 = vmul.f32 %v2843_v2, %v2184_v8 }
 0x8b6   : > { %v2189_v13 = vsel %vm2188_vm15, %v2843_v2, %v2185_v10 }
 0x8b7   : > { %v2190_v15 = vmul.f32 %v2189_v13, %v2173_v56 }
 0x8b9   : > { %v2194_v17 = vmul.f32 %v2800_v12, %v2190_v15 }
 0x8bb   : > { %v2198_v18 = vadd.f32 %v2801_v14, %v2194_v17 }
 0x8bd   : > { %v2221_v19 = vpack.c.bf16 %v2198_v18, %v2198_v18 }
 0x8bf   : > { %2692 = vmatmul.msk.bf16.vlgmr.msra.gmra.mxu0 %vm859_vm0, %v2221_v19 }
 0x93c   : > { %v2249_v23 = vpop.f32.mrf.mxu0 }
 0x93d   : > { %v2250_v24 = vadd.f32 %v2802_v22, %v2249_v23 }
 0x93f   : > { %v2253_v25 = vmax.f32 %v2250_v24, 0.0 }
 0x941   : > { %v2254_v27 = vpack.c.bf16 %v2253_v25, %v2253_v25 }
 0x943   : > { %2314 = vmatmul.bf16.vlgmr.msrb.gmra.mxu1 %v2254_v27 }
 0x944   : > { %v2251_v28 = vpop.f32.mrf.mxu0 }
 0x9c0   : > { %v2315_v30 = vpop.f32.mrf.mxu1 }
 0x9c1   : > { %v2316_v31 = vadd.f32 %v2803_v29, %v2315_v30 }
 0x9c3   : > { %v2319_v32 = vadd.f32 %v2316_v31, %v2198_v18 }
 0x9c5   : > { %v2322_v33 = vsel %vm859_vm0, %v2319_v32, 0.0 }
 0x9c6   : > { %2323 = vadd.xlane.f32.xlu2 %v2322_v33 }
 0x9c8   : > { %v2317_v34 = vpop.f32.mrf.mxu1 }
 0xa39   : > { %v2324_v35 = vpop.xlane.xlu2 %2323 }
 0xa3a   : > { %v2325_v36 = vmul.f32 %v2324_v35, %v3146_v52 }
 0xa3c   : > { %v2326_v9 = vsub.f32 %v2319_v32, %v2325_v36 }
 0xa3e   : > { %v2327_v37 = vmul.f32 %v2326_v9, %v2326_v9 }
 0xa40   : > { %v2328_v16 = vsel %vm859_vm0, %v2327_v37, 0.0 }
 0xa41   : > { %2329 = vadd.xlane.f32.xlu0 %v2328_v16 }
 0xab4   : > { %v2330_v38 = vpop.xlane.xlu0 %2329 }
 0xab5   : > { %v2331_v39 = vmul.f32 %v2330_v38, %v3146_v52  ;;  %v2805_v52 = vld [vmem:[%s3395_s23] ss:$0 sm:$0xff] }
 0xab7   : > { %v2332_v40 = vadd.f32 1e-05, %v2331_v39 }
 0xab9   : > { %2844 = vrsqrt.f32 %v2332_v40  ;;  %vm2339_vm2 = vweird.f32 %v2332_v40 }
 0xabf   : > { %v2845_v41 = vpop.eup %2844 }
 0xac0   : > { %v2334_v42 = vmul.f32 %v2845_v41, %v2332_v40  ;;  %vm2340_vm1 = vweird.f32 %v2845_v41 }
 0xac1   : > { %vm2341_vm3 = vmor %vm2339_vm2, %vm2340_vm1 }
 0xac2   : > { %v2335_v43 = vmul.f32 %v2845_v41, %v2334_v42 }
 0xac4   : > { %v2336_v44 = vmul.f32 0.5, %v2335_v43 }
 0xac6   : > { %v2337_v45 = vsub.f32 1.5, %v2336_v44 }
 0xac8   : > { %v2338_v46 = vmul.f32 %v2845_v41, %v2337_v45 }
 0xaca   : > { %v2342_v48 = vsel %vm2341_vm3, %v2845_v41, %v2338_v46 }
 0xacb   : > { %v2343_v49 = vmul.f32 %v2342_v48, %v2326_v9 }
 0xacd   : > { %v2347_v50 = vmul.f32 %v2804_v47, %v2343_v49 }
 0xacf   : > { %v2351_v51 = vadd.f32 %v2805_v52, %v2347_v50 }
 0xad1   : > { %2352 = vst.msk [vmem:[%s777_s28] sm:$0xff] %vm859_vm0, %v2351_v51 }
 0xad2 PF: > { %s3423_s29 = sld [smem:[#allocation2_spill]] }
 0xad8   : > { %s34_s5 = sadd.s32 1, %s3423_s29  }
 0xad9   : > { %p31_p4 = scmp.ge.s32.totalorder %s34_s5, 4  }
 0xadb   :  { %33 = sbr.rel (!%p31_p4) target bundleno = 11 (0xb), region = 155 }

</bundles_post_ra>
